<compile_context>
chip_gen: v7x
topology: tpu7x:2x2x1
jax: 0.10.0
libtpu: 0.0.40
codegen_flags: <defaults>
</compile_context>

<pallas_src>
from typing import Dict, List

import jax
import jax.numpy as jnp
from jax.experimental import pallas as pl
from jax.experimental.pallas import tpu as pltpu

CPAD = 128                       # lane padding for the matmul N (out-channel) dim
CHANNELS = [4, 8, 16, 32]        # synthetic backbone: cin, stage1, stage2, stage3


# ----------------------------------------------------------------------------
# Host-side layout helpers (one-time, cheap)
# ----------------------------------------------------------------------------
def _s2d_topleft_pad(x_nhwc: jnp.ndarray) -> jnp.ndarray:
    """Space-to-depth by 2 plus a one-block zero border at top/left.

    (N, H, W, C) -> (N, H//2+1, W//2+1, 4*C) with
    out[n, a+1, b+1, (2p+q)*C + c] = x[n, 2a+p, 2b+q, c].
    """
    N, H, W, C = x_nhwc.shape
    s = x_nhwc.reshape(N, H // 2, 2, W // 2, 2, C)
    s = s.transpose(0, 1, 3, 2, 4, 5).reshape(N, H // 2, W // 2, 4 * C)
    return jnp.pad(s, ((0, 0), (1, 0), (1, 0), (0, 0)))


def _pack_stage_weights(w: jnp.ndarray) -> jnp.ndarray:
    """Repack (3,3,cin,cout) conv weights for the S2D/im2col formulation.

    K layout = [tap (da,db) major, phase (p,q), cin minor], tap/phase -> original
    (kh,kw) via kh = 2*da+p-1, kw = 2*db+q-1 (out-of-window combos stay zero).
    Returns (16*cin, 128) bf16 (out channels padded to 128 lanes).
    """
    cin, cout = w.shape[2], w.shape[3]
    wp = jnp.zeros((16 * cin, CPAD), jnp.float32)
    for da in range(2):
        for db in range(2):
            for p in range(2):
                for q in range(2):
                    kh, kw = 2 * da + p - 1, 2 * db + q - 1
                    if 0 <= kh <= 2 and 0 <= kw <= 2:
                        base = ((2 * da + db) * 4 + (2 * p + q)) * cin
                        wp = wp.at[base:base + cin, :cout].set(w[kh, kw])
    return wp.astype(jnp.bfloat16)


# ----------------------------------------------------------------------------
# Fused Pallas kernel: 3 x (conv3x3 stride2 pad1 + bias + ReLU), one batch elem
# ----------------------------------------------------------------------------
def _fused_backbone_kernel(sp1_ref, w1_ref, w2_ref, w3_ref, b_ref,
                           y1_ref, y2_ref, y3_ref):
    """sp1_ref : (1, ho1+1, wo1+1, 4*cin) bf16  S2D input with zero top/left halo
       w{s}_ref: (16*cin_s, 128) bf16           repacked stage weights
       b_ref   : (3, 128) f32                   per-stage bias (lane-padded)
       y{s}_ref: (1, ho_s*wo_s, 128) bf16       lane-dense, sublane-dense outputs
    """
    b_all = b_ref[...]                                   # (3, 128) f32

    def conv_stage(spad, w_ref_, bias, hb, wb):
        # spad: (hb+1, wb+1, 4*cin) bf16.  Four contiguous shifted tap slices ->
        # single im2col matmul (hb*wb, 16*cin) @ (16*cin, 128), f32 accumulate.
        taps = [spad[da:da + hb, db:db + wb, :]
                for da in (0, 1) for db in (0, 1)]
        col = jnp.concatenate(taps, axis=-1).reshape(hb * wb, -1)
        acc = jnp.dot(col, w_ref_[...], preferred_element_type=jnp.float32)
        return jnp.maximum(acc + bias, 0.0)              # (hb*wb, 128) f32

    def s2d_pad(y, hb, wb, c):
        # y: (2*hb, 2*wb, c) -> (hb+1, wb+1, 4c), channel order (2p+q)*c + ch.
        # Phase split uses minor-dim-preserving reshape + static slices only.
        yr = y.reshape(hb, 2, wb, 2, c)
        s = jnp.concatenate([yr[:, 0, :, 0, :], yr[:, 0, :, 1, :],
                             yr[:, 1, :, 0, :], yr[:, 1, :, 1, :]], axis=-1)
        s = jnp.concatenate([jnp.zeros((1, wb, 4 * c), s.dtype), s], axis=0)
        s = jnp.concatenate([jnp.zeros((hb + 1, 1, 4 * c), s.dtype), s], axis=1)
        return s

    c1 = w2_ref.shape[0] // 16      # stage-1 out channels (stage-2 cin)
    c2 = w3_ref.shape[0] // 16      # stage-2 out channels (stage-3 cin)

    # ---- stage 1 ------------------------------------------------------------
    ho1p, wo1p, k1 = sp1_ref.shape[1], sp1_ref.shape[2], sp1_ref.shape[3]
    ho1, wo1 = ho1p - 1, wo1p - 1
    spad1 = sp1_ref[...].reshape(ho1p, wo1p, k1)
    out1 = conv_stage(spad1, w1_ref, b_all[0:1], ho1, wo1)
    y1_ref[...] = out1.reshape(1, ho1 * wo1, CPAD).astype(y1_ref.dtype)

    # ---- stage 2 ------------------------------------------------------------
    ho2, wo2 = ho1 // 2, wo1 // 2
    y1_act = out1[:, :c1].astype(jnp.bfloat16).reshape(ho1, wo1, c1)
    spad2 = s2d_pad(y1_act, ho2, wo2, c1)
    out2 = conv_stage(spad2, w2_ref, b_all[1:2], ho2, wo2)
    y2_ref[...] = out2.reshape(1, ho2 * wo2, CPAD).astype(y2_ref.dtype)

    # ---- stage 3 ------------------------------------------------------------
    ho3, wo3 = ho2 // 2, wo2 // 2
    y2_act = out2[:, :c2].astype(jnp.bfloat16).reshape(ho2, wo2, c2)
    spad3 = s2d_pad(y2_act, ho3, wo3, c2)
    out3 = conv_stage(spad3, w3_ref, b_all[2:3], ho3, wo3)
    y3_ref[...] = out3.reshape(1, ho3 * wo3, CPAD).astype(y3_ref.dtype)


def _fused_backbone_forward(x_nchw: jnp.ndarray, w1p, w2p, w3p,
                            b_packed) -> List[jnp.ndarray]:
    """x_nchw: (N, C, H, W).  Returns three NHWC bf16 maps, channels padded to 128."""
    N, C, H, W = x_nchw.shape
    assert H % 8 == 0 and W % 8 == 0, "need H, W divisible by 8 (three stride-2 stages)"

    # One-time layout glue: NCHW -> NHWC, space-to-depth + halo, bf16 (no 128-pad).
    x_nhwc = jnp.transpose(x_nchw, (0, 2, 3, 1))
    sp1 = _s2d_topleft_pad(x_nhwc).astype(jnp.bfloat16)      # (N, H/2+1, W/2+1, 4C)

    ho1, wo1 = H // 2, W // 2
    ho2, wo2 = H // 4, W // 4
    ho3, wo3 = H // 8, W // 8
    hp, wp, kc = ho1 + 1, wo1 + 1, 4 * C

    out_shape = (
        jax.ShapeDtypeStruct((N, ho1 * wo1, CPAD), jnp.bfloat16),
        jax.ShapeDtypeStruct((N, ho2 * wo2, CPAD), jnp.bfloat16),
        jax.ShapeDtypeStruct((N, ho3 * wo3, CPAD), jnp.bfloat16),
    )

    y1, y2, y3 = pl.pallas_call(
        _fused_backbone_kernel,
        out_shape=out_shape,
        grid=(N,),
        in_specs=[
            pl.BlockSpec((1, hp, wp, kc), lambda n: (n, 0, 0, 0)),
            # weights/bias: constant index_map -> stay VMEM-resident across the grid
            pl.BlockSpec(w1p.shape, lambda n: (0, 0)),
            pl.BlockSpec(w2p.shape, lambda n: (0, 0)),
            pl.BlockSpec(w3p.shape, lambda n: (0, 0)),
            pl.BlockSpec(b_packed.shape, lambda n: (0, 0)),
        ],
        out_specs=(
            pl.BlockSpec((1, ho1 * wo1, CPAD), lambda n: (n, 0, 0)),
            pl.BlockSpec((1, ho2 * wo2, CPAD), lambda n: (n, 0, 0)),
            pl.BlockSpec((1, ho3 * wo3, CPAD), lambda n: (n, 0, 0)),
        ),
        compiler_params=pltpu.CompilerParams(
            dimension_semantics=("parallel",)),
    )(sp1, w1p, w2p, w3p, b_packed)

    return [y1.reshape(N, ho1, wo1, CPAD),
            y2.reshape(N, ho2, wo2, CPAD),
            y3.reshape(N, ho3, wo3, CPAD)]


# ----------------------------------------------------------------------------
# Synthetic multi-scale backbone + DinoDistillationStudent wrapper
# ----------------------------------------------------------------------------
class SyntheticBackbone:
    """Tiny 3-stage conv backbone returning a list of NHWC feature maps."""

    def __init__(self, in_channels: int, key: jax.Array):
        assert in_channels == CHANNELS[0]
        self.channels = CHANNELS
        self.params = []
        for si in range(3):
            cin, cout = self.channels[si], self.channels[si + 1]
            key, k_w, k_b = jax.random.split(key, 3)
            w = jax.random.normal(k_w, (3, 3, cin, cout), jnp.float32) * 0.1
            bias = jax.random.normal(k_b, (cout,), jnp.float32) * 0.01
            self.params.append((w, bias))

        # One-time packing into the S2D/im2col weight layout the kernel consumes.
        self.w_packed = [_pack_stage_weights(w) for (w, _) in self.params]
        self.b_packed = jnp.stack(
            [jnp.pad(b, (0, CPAD - b.shape[0])) for (_, b) in self.params],
            axis=0).astype(jnp.float32)                       # (3, 128)

    def out_strides(self) -> List[int]:
        return [2, 4, 8]

    def forward(self, x_nchw: jnp.ndarray) -> List[jnp.ndarray]:
        feats_padded = _fused_backbone_forward(
            x_nchw, self.w_packed[0], self.w_packed[1], self.w_packed[2],
            self.b_packed)
        # Keep NHWC (no per-level NCHW transpose / extra HBM pass); strip only the
        # 128-lane channel padding.
        return [y[..., :self.channels[s + 1]] for s, y in enumerate(feats_padded)]


class DinoDistillationStudent:
    """JAX/Pallas port of the DINO distillation student wrapper."""

    def __init__(self, output_keys: List[str], backbone: SyntheticBackbone):
        self.backbone = backbone
        self.output_keys = output_keys

    def out_strides(self):
        return self.backbone.out_strides()

    def out_keys(self):
        return self.output_keys

    def forward(self, x: jnp.ndarray) -> Dict[str, jnp.ndarray]:
        feats = self.backbone.forward(x)
        return {k: v for k, v in zip(self.output_keys, feats)}


# ----------------------------------------------------------------------------
# Pure-JAX reference (bf16-rounded operands, f32 accumulation) for validation
# ----------------------------------------------------------------------------
def _reference_forward(x_nchw, params):
    x = jnp.transpose(x_nchw, (0, 2, 3, 1)).astype(jnp.float32)
    feats = []
    for (w, b) in params:
        lhs = x.astype(jnp.bfloat16).astype(jnp.float32)
        rhs = w.astype(jnp.bfloat16).astype(jnp.float32)
        y = jax.lax.conv_general_dilated(
            lhs, rhs, window_strides=(2, 2), padding=((1, 1), (1, 1)),
            dimension_numbers=("NHWC", "HWIO", "NHWC"),
            precision=jax.lax.Precision.HIGHEST)
        x = jnp.maximum(y + b[None, None, None, :], 0.0)
        feats.append(x)                                   # NHWC
    return feats


# ----------------------------------------------------------------------------
# Main
# ----------------------------------------------------------------------------
if __name__ == "__main__":
    key = jax.random.PRNGKey(0)
    k_in, k_params = jax.random.split(key)

    # PyTorch-style NCHW input: batch=2, channels=4, spatial=16x16
    x = jax.random.normal(k_in, (2, 4, 16, 16), jnp.float32)

    backbone = SyntheticBackbone(in_channels=4, key=k_params)
    student = DinoDistillationStudent(
        output_keys=["level_1", "level_2", "level_3"], backbone=backbone)

    out = jax.jit(student.forward)(x)
    for v in out.values():
        jax.block_until_ready(v)

    # NHWC feature maps following the synthetic backbone strides.
    assert out["level_1"].shape == (2, 8, 8, 8)
    assert out["level_2"].shape == (2, 4, 4, 16)
    assert out["level_3"].shape == (2, 2, 2, 32)
    assert student.out_keys() == ["level_1", "level_2", "level_3"]
    assert student.out_strides() == [2, 4, 8]

    # Numerical check against a pure-JAX reference of the same bf16-operand conv.
    ref = _reference_forward(x, backbone.params)
    for idx, name in enumerate(["level_1", "level_2", "level_3"]):
        ok = jnp.allclose(out[name].astype(jnp.float32), ref[idx],
                          rtol=2e-2, atol=2e-2)
        assert bool(ok), f"mismatch vs reference at {name}"

    print("KERNEL_OK")
</pallas_src>

<mosaic_0001>
module attributes {stable_mosaic.version = 11 : i64} {
  func.func @_fused_backbone_kernel(%arg0: i32, %arg1: memref<1x9x9x16xbf16, #tpu.memory_space<vmem>>, %arg2: memref<64x128xbf16, #tpu.memory_space<vmem>>, %arg3: memref<128x128xbf16, #tpu.memory_space<vmem>>, %arg4: memref<256x128xbf16, #tpu.memory_space<vmem>>, %arg5: memref<3x128xf32, #tpu.memory_space<vmem>>, %arg6: memref<1x64x128xbf16, #tpu.memory_space<vmem>>, %arg7: memref<1x16x128xbf16, #tpu.memory_space<vmem>>, %arg8: memref<1x4x128xbf16, #tpu.memory_space<vmem>>) attributes {dimension_semantics = [#tpu.dimension_semantics<parallel>], iteration_bounds = array<i64: 2>, scalar_prefetch = 0 : i64, scratch_operands = 0 : i64, tpu.core_type = #tpu.core_type<tc>, window_params = [{transform_indices = @transform_0, window_bounds = array<i64: 1, 9, 9, 16>}, {pipeline_mode = #tpu.pipeline_mode<synchronous>, transform_indices = @transform_1, window_bounds = array<i64: 64, 128>}, {pipeline_mode = #tpu.pipeline_mode<synchronous>, transform_indices = @transform_2, window_bounds = array<i64: 128, 128>}, {pipeline_mode = #tpu.pipeline_mode<synchronous>, transform_indices = @transform_3, window_bounds = array<i64: 256, 128>}, {pipeline_mode = #tpu.pipeline_mode<synchronous>, transform_indices = @transform_4, window_bounds = array<i64: 3, 128>}, {transform_indices = @transform_5, window_bounds = array<i64: 1, 64, 128>}, {transform_indices = @transform_6, window_bounds = array<i64: 1, 16, 128>}, {transform_indices = @transform_7, window_bounds = array<i64: 1, 4, 128>}]} {
    %c0 = arith.constant 0 : index
    %c0_0 = arith.constant 0 : index
    %0 = vector.load %arg5[%c0, %c0_0] : memref<3x128xf32, #tpu.memory_space<vmem>>, vector<3x128xf32>
    %c0_1 = arith.constant 0 : index
    %c0_2 = arith.constant 0 : index
    %c0_3 = arith.constant 0 : index
    %c0_4 = arith.constant 0 : index
    %1 = vector.load %arg1[%c0_1, %c0_2, %c0_3, %c0_4] : memref<1x9x9x16xbf16, #tpu.memory_space<vmem>>, vector<1x9x9x16xbf16>
    %2 = vector.shape_cast %1 : vector<1x9x9x16xbf16> to vector<9x9x16xbf16>
    %3 = vector.extract_strided_slice %0 {offsets = [0, 0], sizes = [1, 128], strides = [1, 1]} : vector<3x128xf32> to vector<1x128xf32>
    %4 = vector.extract_strided_slice %2 {offsets = [0, 0, 0], sizes = [8, 8, 16], strides = [1, 1, 1]} : vector<9x9x16xbf16> to vector<8x8x16xbf16>
    %5 = vector.extract_strided_slice %2 {offsets = [0, 1, 0], sizes = [8, 8, 16], strides = [1, 1, 1]} : vector<9x9x16xbf16> to vector<8x8x16xbf16>
    %6 = vector.extract_strided_slice %2 {offsets = [1, 0, 0], sizes = [8, 8, 16], strides = [1, 1, 1]} : vector<9x9x16xbf16> to vector<8x8x16xbf16>
    %7 = vector.extract_strided_slice %2 {offsets = [1, 1, 0], sizes = [8, 8, 16], strides = [1, 1, 1]} : vector<9x9x16xbf16> to vector<8x8x16xbf16>
    %8 = tpu.concatenate %4, %5, %6, %7 in 2 : vector<8x8x16xbf16>, vector<8x8x16xbf16>, vector<8x8x16xbf16>, vector<8x8x16xbf16> -> vector<8x8x64xbf16>
    %9 = vector.shape_cast %8 : vector<8x8x64xbf16> to vector<64x64xbf16>
    %c0_5 = arith.constant 0 : index
    %c0_6 = arith.constant 0 : index
    %10 = vector.load %arg2[%c0_5, %c0_6] : memref<64x128xbf16, #tpu.memory_space<vmem>>, vector<64x128xbf16>
    %cst = arith.constant dense<0.000000e+00> : vector<64x128xf32>
    %11 = tpu.matmul %9, %10, %cst {dimension_numbers = #tpu.dot_dimension_numbers<[1], [0], [0], [1], [0, 0, 1, 1], [], []>} : vector<64x64xbf16>, vector<64x128xbf16>, vector<64x128xf32> -> vector<64x128xf32>
    %12 = vector.broadcast %3 : vector<1x128xf32> to vector<64x128xf32>
    %13 = arith.addf %11, %12 : vector<64x128xf32>
    %cst_7 = arith.constant 0.000000e+00 : f32
    %14 = vector.broadcast %cst_7 : f32 to vector<64x128xf32>
    %15 = arith.maximumf %13, %14 : vector<64x128xf32>
    %16 = vector.shape_cast %15 : vector<64x128xf32> to vector<1x64x128xf32>
    %17 = arith.truncf %16 : vector<1x64x128xf32> to vector<1x64x128xbf16>
    %c0_8 = arith.constant 0 : index
    %c0_9 = arith.constant 0 : index
    %c0_10 = arith.constant 0 : index
    %18 = vector.load %arg6[%c0_8, %c0_9, %c0_10] : memref<1x64x128xbf16, #tpu.memory_space<vmem>>, vector<1x64x128xbf16>
    tpu.vector_store %arg6[%c0_8, %c0_9, %c0_10], %17 {strides = array<i32>} : memref<1x64x128xbf16, #tpu.memory_space<vmem>>, vector<1x64x128xbf16>,
    %19 = vector.extract_strided_slice %15 {offsets = [0, 0], sizes = [64, 8], strides = [1, 1]} : vector<64x128xf32> to vector<64x8xf32>
    %20 = arith.truncf %19 : vector<64x8xf32> to vector<64x8xbf16>
    %21 = vector.shape_cast %20 : vector<64x8xbf16> to vector<8x8x8xbf16>
    %22 = vector.shape_cast %21 : vector<8x8x8xbf16> to vector<4x2x4x2x8xbf16>
    %23 = vector.extract_strided_slice %22 {offsets = [0, 0, 0, 0, 0], sizes = [4, 1, 4, 1, 8], strides = [1, 1, 1, 1, 1]} : vector<4x2x4x2x8xbf16> to vector<4x1x4x1x8xbf16>
    %24 = vector.shape_cast %23 : vector<4x1x4x1x8xbf16> to vector<4x4x8xbf16>
    %25 = vector.extract_strided_slice %22 {offsets = [0, 0, 0, 1, 0], sizes = [4, 1, 4, 1, 8], strides = [1, 1, 1, 1, 1]} : vector<4x2x4x2x8xbf16> to vector<4x1x4x1x8xbf16>
    %26 = vector.shape_cast %25 : vector<4x1x4x1x8xbf16> to vector<4x4x8xbf16>
    %27 = vector.extract_strided_slice %22 {offsets = [0, 1, 0, 0, 0], sizes = [4, 1, 4, 1, 8], strides = [1, 1, 1, 1, 1]} : vector<4x2x4x2x8xbf16> to vector<4x1x4x1x8xbf16>
    %28 = vector.shape_cast %27 : vector<4x1x4x1x8xbf16> to vector<4x4x8xbf16>
    %29 = vector.extract_strided_slice %22 {offsets = [0, 1, 0, 1, 0], sizes = [4, 1, 4, 1, 8], strides = [1, 1, 1, 1, 1]} : vector<4x2x4x2x8xbf16> to vector<4x1x4x1x8xbf16>
    %30 = vector.shape_cast %29 : vector<4x1x4x1x8xbf16> to vector<4x4x8xbf16>
    %31 = tpu.concatenate %24, %26, %28, %30 in 2 : vector<4x4x8xbf16>, vector<4x4x8xbf16>, vector<4x4x8xbf16>, vector<4x4x8xbf16> -> vector<4x4x32xbf16>
    %cst_11 = arith.constant 0.000000e+00 : bf16
    %32 = vector.broadcast %cst_11 : bf16 to vector<1x4x32xbf16>
    %33 = tpu.concatenate %32, %31 in 0 : vector<1x4x32xbf16>, vector<4x4x32xbf16> -> vector<5x4x32xbf16>
    %cst_12 = arith.constant 0.000000e+00 : bf16
    %34 = vector.broadcast %cst_12 : bf16 to vector<5x1x32xbf16>
    %35 = tpu.concatenate %34, %33 in 1 : vector<5x1x32xbf16>, vector<5x4x32xbf16> -> vector<5x5x32xbf16>
    %36 = vector.extract_strided_slice %0 {offsets = [1, 0], sizes = [1, 128], strides = [1, 1]} : vector<3x128xf32> to vector<1x128xf32>
    %37 = vector.extract_strided_slice %35 {offsets = [0, 0, 0], sizes = [4, 4, 32], strides = [1, 1, 1]} : vector<5x5x32xbf16> to vector<4x4x32xbf16>
    %38 = vector.extract_strided_slice %35 {offsets = [0, 1, 0], sizes = [4, 4, 32], strides = [1, 1, 1]} : vector<5x5x32xbf16> to vector<4x4x32xbf16>
    %39 = vector.extract_strided_slice %35 {offsets = [1, 0, 0], sizes = [4, 4, 32], strides = [1, 1, 1]} : vector<5x5x32xbf16> to vector<4x4x32xbf16>
    %40 = vector.extract_strided_slice %35 {offsets = [1, 1, 0], sizes = [4, 4, 32], strides = [1, 1, 1]} : vector<5x5x32xbf16> to vector<4x4x32xbf16>
    %41 = tpu.concatenate %37, %38, %39, %40 in 2 : vector<4x4x32xbf16>, vector<4x4x32xbf16>, vector<4x4x32xbf16>, vector<4x4x32xbf16> -> vector<4x4x128xbf16>
    %42 = vector.shape_cast %41 : vector<4x4x128xbf16> to vector<16x128xbf16>
    %c0_13 = arith.constant 0 : index
    %c0_14 = arith.constant 0 : index
    %43 = vector.load %arg3[%c0_13, %c0_14] : memref<128x128xbf16, #tpu.memory_space<vmem>>, vector<128x128xbf16>
    %cst_15 = arith.constant dense<0.000000e+00> : vector<16x128xf32>
    %44 = tpu.matmul %42, %43, %cst_15 {dimension_numbers = #tpu.dot_dimension_numbers<[1], [0], [0], [1], [0, 0, 1, 1], [], []>} : vector<16x128xbf16>, vector<128x128xbf16>, vector<16x128xf32> -> vector<16x128xf32>
    %45 = vector.broadcast %36 : vector<1x128xf32> to vector<16x128xf32>
    %46 = arith.addf %44, %45 : vector<16x128xf32>
    %cst_16 = arith.constant 0.000000e+00 : f32
    %47 = vector.broadcast %cst_16 : f32 to vector<16x128xf32>
    %48 = arith.maximumf %46, %47 : vector<16x128xf32>
    %49 = vector.shape_cast %48 : vector<16x128xf32> to vector<1x16x128xf32>
    %50 = arith.truncf %49 : vector<1x16x128xf32> to vector<1x16x128xbf16>
    %c0_17 = arith.constant 0 : index
    %c0_18 = arith.constant 0 : index
    %c0_19 = arith.constant 0 : index
    %51 = vector.load %arg7[%c0_17, %c0_18, %c0_19] : memref<1x16x128xbf16, #tpu.memory_space<vmem>>, vector<1x16x128xbf16>
    tpu.vector_store %arg7[%c0_17, %c0_18, %c0_19], %50 {strides = array<i32>} : memref<1x16x128xbf16, #tpu.memory_space<vmem>>, vector<1x16x128xbf16>,
    %52 = vector.extract_strided_slice %48 {offsets = [0, 0], sizes = [16, 16], strides = [1, 1]} : vector<16x128xf32> to vector<16x16xf32>
    %53 = arith.truncf %52 : vector<16x16xf32> to vector<16x16xbf16>
    %54 = vector.shape_cast %53 : vector<16x16xbf16> to vector<4x4x16xbf16>
    %55 = vector.shape_cast %54 : vector<4x4x16xbf16> to vector<2x2x2x2x16xbf16>
    %56 = vector.extract_strided_slice %55 {offsets = [0, 0, 0, 0, 0], sizes = [2, 1, 2, 1, 16], strides = [1, 1, 1, 1, 1]} : vector<2x2x2x2x16xbf16> to vector<2x1x2x1x16xbf16>
    %57 = vector.shape_cast %56 : vector<2x1x2x1x16xbf16> to vector<2x2x16xbf16>
    %58 = vector.extract_strided_slice %55 {offsets = [0, 0, 0, 1, 0], sizes = [2, 1, 2, 1, 16], strides = [1, 1, 1, 1, 1]} : vector<2x2x2x2x16xbf16> to vector<2x1x2x1x16xbf16>
    %59 = vector.shape_cast %58 : vector<2x1x2x1x16xbf16> to vector<2x2x16xbf16>
    %60 = vector.extract_strided_slice %55 {offsets = [0, 1, 0, 0, 0], sizes = [2, 1, 2, 1, 16], strides = [1, 1, 1, 1, 1]} : vector<2x2x2x2x16xbf16> to vector<2x1x2x1x16xbf16>
    %61 = vector.shape_cast %60 : vector<2x1x2x1x16xbf16> to vector<2x2x16xbf16>
    %62 = vector.extract_strided_slice %55 {offsets = [0, 1, 0, 1, 0], sizes = [2, 1, 2, 1, 16], strides = [1, 1, 1, 1, 1]} : vector<2x2x2x2x16xbf16> to vector<2x1x2x1x16xbf16>
    %63 = vector.shape_cast %62 : vector<2x1x2x1x16xbf16> to vector<2x2x16xbf16>
    %64 = tpu.concatenate %57, %59, %61, %63 in 2 : vector<2x2x16xbf16>, vector<2x2x16xbf16>, vector<2x2x16xbf16>, vector<2x2x16xbf16> -> vector<2x2x64xbf16>
    %cst_20 = arith.constant 0.000000e+00 : bf16
    %65 = vector.broadcast %cst_20 : bf16 to vector<1x2x64xbf16>
    %66 = tpu.concatenate %65, %64 in 0 : vector<1x2x64xbf16>, vector<2x2x64xbf16> -> vector<3x2x64xbf16>
    %cst_21 = arith.constant 0.000000e+00 : bf16
    %67 = vector.broadcast %cst_21 : bf16 to vector<3x1x64xbf16>
    %68 = tpu.concatenate %67, %66 in 1 : vector<3x1x64xbf16>, vector<3x2x64xbf16> -> vector<3x3x64xbf16>
    %69 = vector.extract_strided_slice %0 {offsets = [2, 0], sizes = [1, 128], strides = [1, 1]} : vector<3x128xf32> to vector<1x128xf32>
    %70 = vector.extract_strided_slice %68 {offsets = [0, 0, 0], sizes = [2, 2, 64], strides = [1, 1, 1]} : vector<3x3x64xbf16> to vector<2x2x64xbf16>
    %71 = vector.extract_strided_slice %68 {offsets = [0, 1, 0], sizes = [2, 2, 64], strides = [1, 1, 1]} : vector<3x3x64xbf16> to vector<2x2x64xbf16>
    %72 = vector.extract_strided_slice %68 {offsets = [1, 0, 0], sizes = [2, 2, 64], strides = [1, 1, 1]} : vector<3x3x64xbf16> to vector<2x2x64xbf16>
    %73 = vector.extract_strided_slice %68 {offsets = [1, 1, 0], sizes = [2, 2, 64], strides = [1, 1, 1]} : vector<3x3x64xbf16> to vector<2x2x64xbf16>
    %74 = tpu.concatenate %70, %71, %72, %73 in 2 : vector<2x2x64xbf16>, vector<2x2x64xbf16>, vector<2x2x64xbf16>, vector<2x2x64xbf16> -> vector<2x2x256xbf16>
    %75 = vector.shape_cast %74 : vector<2x2x256xbf16> to vector<4x256xbf16>
    %c0_22 = arith.constant 0 : index
    %c0_23 = arith.constant 0 : index
    %76 = vector.load %arg4[%c0_22, %c0_23] : memref<256x128xbf16, #tpu.memory_space<vmem>>, vector<256x128xbf16>
    %cst_24 = arith.constant dense<0.000000e+00> : vector<4x128xf32>
    %77 = tpu.matmul %75, %76, %cst_24 {dimension_numbers = #tpu.dot_dimension_numbers<[1], [0], [0], [1], [0, 0, 1, 1], [], []>} : vector<4x256xbf16>, vector<256x128xbf16>, vector<4x128xf32> -> vector<4x128xf32>
    %78 = vector.broadcast %69 : vector<1x128xf32> to vector<4x128xf32>
    %79 = arith.addf %77, %78 : vector<4x128xf32>
    %cst_25 = arith.constant 0.000000e+00 : f32
    %80 = vector.broadcast %cst_25 : f32 to vector<4x128xf32>
    %81 = arith.maximumf %79, %80 : vector<4x128xf32>
    %82 = vector.shape_cast %81 : vector<4x128xf32> to vector<1x4x128xf32>
    %83 = arith.truncf %82 : vector<1x4x128xf32> to vector<1x4x128xbf16>
    %c0_26 = arith.constant 0 : index
    %c0_27 = arith.constant 0 : index
    %c0_28 = arith.constant 0 : index
    %84 = vector.load %arg8[%c0_26, %c0_27, %c0_28] : memref<1x4x128xbf16, #tpu.memory_space<vmem>>, vector<1x4x128xbf16>
    tpu.vector_store %arg8[%c0_26, %c0_27, %c0_28], %83 {strides = array<i32>} : memref<1x4x128xbf16, #tpu.memory_space<vmem>>, vector<1x4x128xbf16>,
    return
  }
  func.func @transform_0(%arg0: i32) -> (i32, i32, i32, i32) {
    %c0_i32 = arith.constant 0 : i32
    %c0_i32_0 = arith.constant 0 : i32
    %c0_i32_1 = arith.constant 0 : i32
    %c0_i32_2 = arith.constant 0 : i32
    return %arg0, %c0_i32, %c0_i32_0, %c0_i32_1 : i32, i32, i32, i32
  }
  func.func @transform_1(%arg0: i32) -> (i32, i32) {
    %c0_i32 = arith.constant 0 : i32
    %c0_i32_0 = arith.constant 0 : i32
    %c0_i32_1 = arith.constant 0 : i32
    return %c0_i32, %c0_i32_0 : i32, i32
  }
  func.func @transform_2(%arg0: i32) -> (i32, i32) {
    %c0_i32 = arith.constant 0 : i32
    %c0_i32_0 = arith.constant 0 : i32
    %c0_i32_1 = arith.constant 0 : i32
    return %c0_i32, %c0_i32_0 : i32, i32
  }
  func.func @transform_3(%arg0: i32) -> (i32, i32) {
    %c0_i32 = arith.constant 0 : i32
    %c0_i32_0 = arith.constant 0 : i32
    %c0_i32_1 = arith.constant 0 : i32
    return %c0_i32, %c0_i32_0 : i32, i32
  }
  func.func @transform_4(%arg0: i32) -> (i32, i32) {
    %c0_i32 = arith.constant 0 : i32
    %c0_i32_0 = arith.constant 0 : i32
    %c0_i32_1 = arith.constant 0 : i32
    return %c0_i32, %c0_i32_0 : i32, i32
  }
  func.func @transform_5(%arg0: i32) -> (i32, i32, i32) {
    %c0_i32 = arith.constant 0 : i32
    %c0_i32_0 = arith.constant 0 : i32
    %c0_i32_1 = arith.constant 0 : i32
    return %arg0, %c0_i32, %c0_i32_0 : i32, i32, i32
  }
  func.func @transform_6(%arg0: i32) -> (i32, i32, i32) {
    %c0_i32 = arith.constant 0 : i32
    %c0_i32_0 = arith.constant 0 : i32
    %c0_i32_1 = arith.constant 0 : i32
    return %arg0, %c0_i32, %c0_i32_0 : i32, i32, i32
  }
  func.func @transform_7(%arg0: i32) -> (i32, i32, i32) {
    %c0_i32 = arith.constant 0 : i32
    %c0_i32_0 = arith.constant 0 : i32
    %c0_i32_1 = arith.constant 0 : i32
    return %arg0, %c0_i32, %c0_i32_0 : i32, i32, i32
  }
}

</mosaic_0001>

<bundles_post_ra>
// kernel: forward.1
= control target key start
LH: loop header
LB: loop body
LE: loop exit
PB: predicated region body
PF: predicated region fallthrough
CT: control target
= control target key end

     0   :  { %s3887_s0 = inlined_call_operand.vmem [shape: bf16[2,9,9,16], index: 0, kind: input, shape index: {}]   ;;  %s3888_s1 = inlined_call_operand.vmem [shape: bf16[64,128], index: 1, kind: input, shape index: {}]   ;;  %s3889_s2 = inlined_call_operand.vmem [shape: bf16[128,128], index: 2, kind: input, shape index: {}]   ;;  %s3890_s3 = inlined_call_operand.vmem [shape: bf16[256,128], index: 3, kind: input, shape index: {}]   ;;  %s3891_s4 = inlined_call_operand.vmem [shape: f32[3,128], index: 4, kind: input, shape index: {}]   ;;  %s3892_s5 = inlined_call_operand.hbm [shape: bf16[2,64,128], index: 5, kind: output, shape index: {0}]   ;;  %s3893_s6 = inlined_call_operand.hbm [shape: bf16[2,16,128], index: 6, kind: output, shape index: {1}]   ;;  %s3894_s7 = inlined_call_operand.hbm [shape: bf16[2,4,128], index: 7, kind: output, shape index: {2}]  }
   0x1   :  { %3898 = sst [smem:[#allocation9_spill]] %s3887_s0 }
   0x2   :  { %3899 = sst [smem:[#allocation10_spill]] %s3888_s1 }
   0x3   :  { %13 = vsyncpa [#allocation3], 0 }
   0x4   :  { %15 = vsyncpa [#allocation3 + $0x1], 0 }
   0x5   :  { %16 = vsyncpa [#allocation5], 0 }
   0x6   :  { %18 = vsyncpa [#allocation5 + $0x1], 0  ;;  %s3000_s24 = smov 0   ;;  %s3002_s25 = smov 0  }
   0x7   :  { %s3004_s26 = smov 0   ;;  %s3006_s27 = smov 0  }
   0x8 LB: > { %s3021_s28 = sadd.s32 4294967295, %s2942_s27   ;;  %s3895_s29 = sadd.s32 4294967294, %s2942_s27   ;;  %s2942_s27 = sphi %s3006_s27, %s3911_s27   ;;  %s2938_s26 = sphi %s3004_s26, %s3910_s26   ;;  %s2934_s25 = sphi %s3002_s25, %s3909_s25   ;;  %s2930_s24 = sphi %s3000_s24, %s3908_s24  }
   0x9   : > { %s3025_s30 = sadd.s32 1, %s2942_s27   ;;  %s141_s8 = sadd.s32 1, %s2938_s26 }
   0xa   : > { %s138_s9 = ssub.s32 %s2942_s27, %s3025_s30  ;;  %p151_p0 = scmp.ne.s32.totalorder %s2938_s26, %s2934_s25 }
   0xb   : > { %p139_p1 = scmp.eq.s32.totalorder %s138_s9, 0  ;;  %p152_p2 = scmp.eq.s32.totalorder %s3021_s28, 1 }
   0xc   : > { %p157_p3 = scmp.ne.s32.totalorder %s2934_s25, %s2930_s24  ;;  %p158_p4 = scmp.eq.s32.totalorder %s3895_s29, 1 }
   0xd   : > { %s3038_s10 = scalar_select %p139_p1, %s2938_s26, %s141_s8  }
   0xe   : > { %p3040_p5 = por %p152_p2, %p151_p0  ;;  %p3044_p6 = por %p158_p4, %p157_p3 }
   0xf   : > { %p2513_p7 = scmp.ge.s32.totalorder %s2942_s27, 1  ;;  %p248_p8 = scmp.lt.s32.totalorder %s2942_s27, 3 }
  0x11   : > { %p249_p9 = pnand %p2513_p7, %p248_p8 }
  0x12   : > { %p290_p10 = scmp.lt.s32.totalorder (!%p249_p9), %s3021_s28, 1  ;;  %s3902_s1 = sld [smem:[#allocation10_spill]] (!%p249_p9)  ;;  %vm479_vm0 = vcmask (!%p249_p9), 130048   ;;  %vm504_vm1 = vcmask (!%p249_p9), 261120   ;;  %vm521_vm2 = vcmask (!%p249_p9), 392192   ;;  %vm594_vm3 = vcmask (!%p249_p9), 523264  }
  0x13   : > { %252 = sbr.rel (%p249_p9) target bundleno = 1449 (0x5a9), region = 40  ;;  %s3903_s0 = sld [smem:[#allocation9_spill]] (!%p249_p9)  ;;  %vm1157_vm4 = vcmask (!%p249_p9), 1041409   ;;  %vm1160_vm5 = vcmask (!%p249_p9), 1042434   ;;  %vm1163_vm6 = vcmask (!%p249_p9), 1043459   ;;  %vm1601_vm7 = vcmask (!%p249_p9), 1040384  }
  0x14   : > { %s2944_s22 = smov (!%p249_p9), 32   ;;  %s2945_s14 = smov (!%p249_p9), 16   ;;  %vm1602_vm8 = vsmask.f32 (!%p249_p9), 256  ;;  %vm1535_vm10 = vcmask (!%p249_p9), 64512   ;;  %vm1556_vm11 = vcmask (!%p249_p9), 195584  }
  0x15   : > { %s3197_s18 = sand.u32 (!%p249_p9), 1, %s2934_s25   ;;  %s2949_s23 = smov (!%p249_p9), 24   ;;  %vm3527_vm9 = vmand (!%p249_p9), %vm1601_vm7, %vm1602_vm8  ;;  %vm2954_vm12 = vmmov (!%p249_p9), 0   ;;  %vm1688_vm13 = vcmask (!%p249_p9), 785408  }
  0x16   : > { %s2514_s19 = sshll.u32 (!%p249_p9), %s3197_s18, 5  ;;  %s3896_s8 = smov (!%p249_p9), 64  }
  0x17   : > { %s3207_s20 = scalar_lea.vmem (!%p249_p9), [#allocation2], %s2514_s19  ;;  %s2339_s17 = sand.u32 (!%p249_p9), 1, %s3021_s28  }
  0x18   : > { %v2791_v0 = vld [vmem:[%s3902_s1] sm:$0xff] (!%p249_p9)   ;;  %v2792_v1 = vld [vmem:[%s3902_s1 + $0x8] sm:$0xff] (!%p249_p9)   ;;  %v2793_v38 = vld [vmem:[%s3902_s1 + $0x10] sm:$0xff] (!%p249_p9)   ;;  %s2358_s9 = sshll.u32 (!%p249_p9), %s3207_s20, 4  ;;  %s2607_s19 = sshll.u32 (!%p249_p9), %s3021_s28, 7  ;;  %s3766_s9 = int_to_ptr.vmem [resolvable:$true] %s2358_s9 }
  0x19   : > { %2675 = vmatprep.subr.bf16.mxu0 (!%p249_p9), %v2791_v0  ;;  %v2794_v42 = vld [vmem:[%s3902_s1 + $0x18] sm:$0xff] (!%p249_p9)  }
  0x1a   : > { %s291_s15 = scalar_select %p290_p10, %s3021_s28, 1  ;;  %2676 = vmatpush3.bf16.msra.mxu0 %v2791_v0 }
  0x1b   : > { %2677 = vmatprep.subr.bf16.mxu0 %v2792_v1 }
  0x1c   : > { %s2711_s16 = smul.u32 72, %s291_s15  ;;  %s2946_s15 = smov 48  }
  0x1e   : > { %s3061_s21 = scalar_lea.vmem %s3903_s0, %s2711_s16  ;;  %2678 = vmatpush3.bf16.msra.mxu0 %v2792_v1  ;;  %s2952_s16 = smov 96  }
  0x1f   : > { %v3064_v2 = vld [vmem:[%s3061_s21 + $0x10] sm:$0xf]  ;;  %v302_v3 = vld [vmem:[%s3061_s21 + $0x14] sm:$0x1]  ;;  %v3068_v4 = vld [vmem:[%s3061_s21 + $0x8] sm:$0xf]  ;;  %2679 = vmatprep.subr.bf16.mxu0 %v2793_v38 }
  0x20   : > { %v2527_v5 = vcombine.low %v3064_v2, %v3064_v2  ;;  %v2520_v6 = vcombine.low %v3064_v2, %v302_v3  ;;  %v300_v7 = vld [vmem:[%s3061_s21 + $0xc] sm:$0x1]  ;;  %v2526_v8 = vcombine.low %v3068_v4, %v3068_v4  ;;  %v3077_v9 = vld [vmem:[%s3061_s21 + $0x20] sm:$0xf]  ;;  %v3080_v10 = vld [vmem:[%s3061_s21 + $0x18] sm:$0xf] }
  0x21   : > { %v2519_v11 = vcombine.low %v3068_v4, %v300_v7  ;;  %v2529_v12 = vcombine.low %v3077_v9, %v3077_v9  ;;  %v2528_v13 = vcombine.low %v3080_v10, %v3080_v10  ;;  %v3088_v14 = vld [vmem:[%s3061_s21] sm:$0xf]  ;;  %v298_v15 = vld [vmem:[%s3061_s21 + $0x4] sm:$0x1]  ;;  %v304_v16 = vld [vmem:[%s3061_s21 + $0x1c] sm:$0x1] }
  0x22   : > { %439 = vrot.lane.b32.xlu1 %v2527_v5, %s2944_s22  ;;  %437 = vrot.lane.b32.xlu0 %v2526_v8, %s2944_s22  ;;  %v370_v17 = vshrl.u32 %v2520_v6, 16  ;;  %v372_v18 = vshll.u32 %v2520_v6, 16  ;;  %v2518_v19 = vcombine.low %v3088_v14, %v298_v15  ;;  %v2521_v20 = vcombine.low %v3080_v10, %v304_v16  ;;  %v306_v21 = vld [vmem:[%s3061_s21 + $0x24] sm:$0x1]  ;;  %v3099_v29 = vld [vmem:[%s3061_s21 + $0x28] sm:$0xf] }
  0x23   : > { %v365_v22 = vshll.u32 %v2519_v11, 16  ;;  %v2522_v26 = vcombine.low %v3077_v9, %v306_v21  ;;  %v363_v28 = vshrl.u32 %v2519_v11, 16  ;;  %v308_v34 = vld [vmem:[%s3061_s21 + $0x2c] sm:$0x1]  ;;  %v3105_v36 = vld [vmem:[%s3061_s21 + $0x38] sm:$0xf]  ;;  %2680 = vmatpush3.bf16.msra.mxu0 %v2793_v38  ;;  %v2530_v5 = vcombine.low %v3099_v29, %v3099_v29 }
  0x24   : > { %v374_v23 = vrot.slane %v372_v18, 1  ;;  %v356_v24 = vshrl.u32 %v2518_v19, 16  ;;  %v358_v25 = vshll.u32 %v2518_v19, 16  ;;  %v379_v27 = vshll.u32 %v2521_v20, 16  ;;  %v312_v37 = vld [vmem:[%s3061_s21 + $0x3c] sm:$0x1]  ;;  %2681 = vmatprep.subr.bf16.mxu0 %v2794_v42 }
  0x25   : > { %v377_v32 = vshrl.u32 %v2521_v20, 16  ;;  %v367_v33 = vrot.slane %v365_v22, 1  ;;  %v386_v40 = vshll.u32 %v2522_v26, 16  ;;  %v3112_v41 = vld [vmem:[%s3061_s21 + $0x30] sm:$0xf]  ;;  %v2523_v46 = vcombine.low %v3099_v29, %v308_v34 }
  0x26   : > { %443 = vrot.lane.b32.xlu1 %v2529_v12, %s2944_s22  ;;  %441 = vrot.lane.b32.xlu0 %v2528_v13, %s2944_s22  ;;  %v375_v30 = vor.u32 %v374_v23, %v370_v17  ;;  %v360_v31 = vrot.slane %v358_v25, 1  ;;  %v381_v35 = vrot.slane %v379_v27, 1  ;;  %v310_v43 = vld [vmem:[%s3061_s21 + $0x34] sm:$0x1]  ;;  %v2525_v47 = vcombine.low %v3105_v36, %v312_v37  ;;  %v314_v0 = vld [vmem:[%s3061_s21 + $0x44] sm:$0x1] }
  0x27   : > { %v368_v45 = vor.u32 %v367_v33, %v363_v28  ;;  %v384_v48 = vshrl.u32 %v2522_v26, 16  ;;  %v388_v49 = vrot.slane %v386_v40, 1  ;;  %v391_v50 = vshrl.u32 %v2523_v46, 16  ;;  %2682 = vmatpush3.bf16.msra.mxu0 %v2794_v42  ;;  %v313_v1 = vld [vmem:[%s3061_s21 + $0x40] sm:$0xf]  ;;  %s2948_s21 = smov 8  }
  0x28   : > { %v361_v39 = vor.u32 %v360_v31, %v356_v24  ;;  %v382_v44 = vor.u32 %v381_v35, %v377_v32  ;;  %v2524_v51 = vcombine.low %v3112_v41, %v310_v43  ;;  %v393_v52 = vshll.u32 %v2523_v46, 16 }
  0x29   : > { %v405_v53 = vshrl.u32 %v2525_v47, 16  ;;  %v407_v54 = vshll.u32 %v2525_v47, 16  ;;  %v389_v56 = vor.u32 %v388_v49, %v384_v48  ;;  %v2531_v3 = vcombine.low %v3112_v41, %v3112_v41 }
  0x2a   : > { %415 = vrot.lane.b32.xlu1 %v375_v30, %s2945_s14  ;;  %411 = vrot.lane.b32.xlu0 %v361_v39, %s2945_s14  ;;  %v398_v55 = vshrl.u32 %v2524_v51, 16  ;;  %v395_v57 = vrot.slane %v393_v52, 1  ;;  %v400_v58 = vshll.u32 %v2524_v51, 16  ;;  %v2534_v6 = vcombine.low %v313_v1, %v314_v0 }
  0x2b   : > { %v409_v60 = vrot.slane %v407_v54, 1  ;;  %v2533_v7 = vcombine.low %v313_v1, %v313_v1  ;;  %v2532_v8 = vcombine.low %v3105_v36, %v3105_v36 }
  0x2c   : > { %v396_v59 = vor.u32 %v395_v57, %v391_v50  ;;  %v402_v61 = vrot.slane %v400_v58, 1  ;;  %v459_v11 = vshll.u32 %v2534_v6, 16  ;;  %v457_v12 = vshrl.u32 %v2534_v6, 16 }
  0x2d   : > { %v410_v62 = vor.u32 %v409_v60, %v405_v53  ;;  %v2947_v6 = vmov 1966171168  }
  0x2e   : > { %417 = vrot.lane.b32.xlu1 %v382_v44, %s2945_s14  ;;  %413 = vrot.lane.b32.xlu0 %v368_v45, %s2945_s14  ;;  %v403_v63 = vor.u32 %v402_v61, %v398_v55  ;;  %v461_v13 = vrot.slane %v459_v11, 1 }
  0x30   : > { %v462_v15 = vor.u32 %v461_v13, %v457_v12 }
  0x32   : > { %465 = vrot.lane.b32.xlu1 %v375_v30, %s2946_s15  ;;  %463 = vrot.lane.b32.xlu0 %v368_v45, %s2946_s15 }
  0x36   : > { %469 = vrot.lane.b32.xlu1 %v389_v56, %s2946_s15  ;;  %467 = vrot.lane.b32.xlu0 %v382_v44, %s2946_s15 }
  0x3a   : > { %421 = vrot.lane.b32.xlu1 %v396_v59, %s2945_s14  ;;  %419 = vrot.lane.b32.xlu0 %v389_v56, %s2945_s14 }
  0x3e   : > { %425 = vrot.lane.b32.xlu1 %v410_v62, %s2945_s14  ;;  %423 = vrot.lane.b32.xlu0 %v403_v63, %s2945_s14 }
  0x42   : > { %447 = vrot.lane.b32.xlu1 %v2531_v3, %s2944_s22  ;;  %445 = vrot.lane.b32.xlu0 %v2530_v5, %s2944_s22  ;;  %v3191_v3 = vld [vmem:[%s3891_s4] sm:$0x7] }
  0x46   : > { %451 = vrot.lane.b32.xlu1 %v2533_v7, %s2944_s22  ;;  %449 = vrot.lane.b32.xlu0 %v2532_v8, %s2944_s22  ;;  %v722_v7 = vunpack.c.l.s4 %v2947_v6 }
  0x48   : > { %v723_v12 = vunpack.c.0.s8 %v722_v7 }
  0x4a   : > { %473 = vrot.lane.b32.xlu1 %v403_v63, %s2946_s15  ;;  %471 = vrot.lane.b32.xlu0 %v396_v59, %s2946_s15 }
  0x4e   : > { %477 = vrot.lane.b32.xlu1 %v462_v15, %s2946_s15  ;;  %475 = vrot.lane.b32.xlu0 %v410_v62, %s2946_s15 }
  0x94   : > { %v440_v16 = vpop.permute.xlu1 %439  ;;  %v438_v17 = vpop.permute.xlu0 %437 }
  0x98   : > { %v444_v18 = vpop.permute.xlu1 %443  ;;  %v442_v19 = vpop.permute.xlu0 %441 }
  0x9c   : > { %v416_v20 = vpop.permute.xlu1 %415  ;;  %v412_v21 = vpop.permute.xlu0 %411 }
  0x9d   : > { %v482_v24 = vsel %vm479_vm0, %v3088_v14, %v412_v21  ;;  %v488_v31 = vsel %vm479_vm0, %v3064_v2, %v416_v20 }
  0x9e   : > { %v506_v28 = vsel %vm504_vm1, %v482_v24, %v438_v17  ;;  %v510_v37 = vsel %vm504_vm1, %v488_v31, %v442_v19 }
  0xa0   : > { %v418_v22 = vpop.permute.xlu1 %417  ;;  %v414_v23 = vpop.permute.xlu0 %413 }
  0xa1   : > { %v485_v25 = vsel %vm479_vm0, %v3068_v4, %v414_v23  ;;  %v491_v32 = vsel %vm479_vm0, %v3080_v10, %v418_v22 }
  0xa2   : > { %v508_v27 = vsel %vm504_vm1, %v485_v25, %v440_v16  ;;  %v512_v34 = vsel %vm504_vm1, %v491_v32, %v444_v18 }
  0xa4   : > { %v466_v26 = vpop.permute.xlu1 %465  ;;  %v464_v30 = vpop.permute.xlu0 %463 }
  0xa5   : > { %v525_v14 = vsel %vm521_vm2, %v508_v27, %v466_v26  ;;  %v523_v33 = vsel %vm521_vm2, %v506_v28, %v464_v30 }
  0xa6   : > { %v2535_v4 = vcombine.low %v523_v33, %v525_v14 }
  0xa8   : > { %v470_v35 = vpop.permute.xlu1 %469  ;;  %2683 = vmatprep.mubr.msk.bf16.mxu0 %vm594_vm3, %v2535_v4  ;;  %v468_v38 = vpop.permute.xlu0 %467 }
  0xa9   : > { %v529_v39 = vsel %vm521_vm2, %v512_v34, %v470_v35  ;;  %v527_v2 = vsel %vm521_vm2, %v510_v37, %v468_v38 }
  0xaa   : > { %v2536_v40 = vcombine.low %v527_v2, %v529_v39 }
  0xac   : > { %v422_v42 = vpop.permute.xlu1 %421  ;;  %2684 = vmatmul.mubr.msk.bf16.vlgmr.msra.gmra.mrb[0].mxu0 %vm594_vm3, %v2536_v40  ;;  %v420_v10 = vpop.permute.xlu0 %419 }
  0xad   : > { %v497_v49 = vsel %vm479_vm0, %v3099_v29, %v422_v42  ;;  %v494_v50 = vsel %vm479_vm0, %v3077_v9, %v420_v10 }
  0xb0   : > { %v426_v43 = vpop.permute.xlu1 %425  ;;  %v424_v44 = vpop.permute.xlu0 %423 }
  0xb1   : > { %v503_v58 = vsel %vm479_vm0, %v3105_v36, %v426_v43  ;;  %v500_v29 = vsel %vm479_vm0, %v3112_v41, %v424_v44  ;;  %v546_v36 = vlaneseq }
  0xb3   : > { %v3185_v1 = vshrl.u32 %v546_v36, 7 }
  0xb4   : > { %v448_v45 = vpop.permute.xlu1 %447  ;;  %v446_v46 = vpop.permute.xlu0 %445 }
  0xb5   : > { %v516_v51 = vsel %vm504_vm1, %v497_v49, %v448_v45  ;;  %v514_v52 = vsel %vm504_vm1, %v494_v50, %v446_v46  ;;  %v548_v41 = vsub.s32 0, %v3185_v1  ;;  %v3205_v21 = vsub.s32 %v723_v12, %v3185_v1 }
  0xb7   : > { %v3194_v5 = vrot.slane %v3191_v3, %v548_v41 }
  0xb8   : > { %v452_v47 = vpop.permute.xlu1 %451  ;;  %v450_v48 = vpop.permute.xlu0 %449 }
  0xb9   : > { %v520_v59 = vsel %vm504_vm1, %v503_v58, %v452_v47  ;;  %v518_v9 = vsel %vm504_vm1, %v500_v29, %v450_v48 }
  0xbc   : > { %v474_v53 = vpop.permute.xlu1 %473  ;;  %v472_v54 = vpop.permute.xlu0 %471 }
  0xbd   : > { %v533_v55 = vsel %vm521_vm2, %v516_v51, %v474_v53  ;;  %v531_v56 = vsel %vm521_vm2, %v514_v52, %v472_v54 }
  0xbe   : > { %v2537_v57 = vcombine.low %v531_v56, %v533_v55 }
  0xc0   : > { %v478_v60 = vpop.permute.xlu1 %477  ;;  %2687 = vmatprep.mubr.msk.bf16.mxu0 %vm594_vm3, %v2537_v57  ;;  %v476_v61 = vpop.permute.xlu0 %475 }
  0xc1   : > { %v537_v62 = vsel %vm521_vm2, %v520_v59, %v478_v60  ;;  %v535_v63 = vsel %vm521_vm2, %v518_v9, %v476_v61 }
  0xc2   : > { %v2538_v0 = vcombine.low %v535_v63, %v537_v62 }
  0xc4   : > { %2688 = vmatmul.mubr.msk.bf16.gmra.mrb[4].mxu0 %vm594_vm3, %v2538_v0 }
 0x17f   : > { %v2685_v8 = vpop.f32.mrb[0].mxu0 }
 0x180   : > { %v650_v11 = vadd.f32 %v2685_v8, %v3194_v5  ;;  %v641_v13 = vpop.f32.mrb[1].mxu0 }
 0x181   : > { %v642_v15 = vadd.f32 %v641_v13, %v3194_v5  ;;  %v2686_v16 = vpop.f32.mrb[2].mxu0 }
 0x182   : > { %v653_v17 = vadd.f32 %v2686_v16, %v3194_v5  ;;  %v644_v18 = vpop.f32.mrb[3].mxu0  ;;  %v674_v20 = vmax.f32 %v650_v11, 0.0 }
 0x183   : > { %v645_v19 = vadd.f32 %v644_v18, %v3194_v5  ;;  %v672_v23 = vmax.f32 %v642_v15, 0.0 }
 0x184   : > { %v675_v22 = vmax.f32 %v653_v17, 0.0 }
 0x185   : > { %v673_v24 = vmax.f32 %v645_v19, 0.0 }
 0x186   : > { %v681_v25 = vpack.c.bf16 %v675_v22, %v674_v20  ;;  %v2556_v26 = vpack.c.bf16 %v675_v22, %v675_v22 }
 0x187   : > { %v680_v27 = vpack.c.bf16 %v673_v24, %v672_v23  ;;  %v2555_v28 = vpack.c.bf16 %v673_v24, %v673_v24 }
 0x188   : > { %2633 = vst [vmem:[%s3207_s20 + $0x8] sm:$0xff] %v681_v25   ;;  %v776_v30 = vrot.slane %v681_v25, %v3205_v21  ;;  %v783_v31 = vrot.slane %v2556_v26, %v3205_v21 }
 0x189   : > { %2612 = vst [vmem:[%s3207_s20] sm:$0xff] %v680_v27   ;;  %v727_v32 = vrot.slane %v680_v27, %v3205_v21  ;;  %v734_v14 = vrot.slane %v2555_v28, %v3205_v21 }
 0x18a   : > { %v784_v33 = vcombine.high %v776_v30, %v776_v30  ;;  %v785_v4 = vcombine.high %v783_v31, %v783_v31  ;;  %v792_v34 = vrot.slane %v776_v30, %v3205_v21  ;;  %v799_v35 = vrot.slane %v783_v31, %v3205_v21 }
 0x18b   : > { %v735_v37 = vcombine.high %v727_v32, %v727_v32  ;;  %v736_v38 = vcombine.high %v734_v14, %v734_v14  ;;  %v743_v39 = vrot.slane %v727_v32, %v3205_v21  ;;  %v750_v2 = vrot.slane %v734_v14, %v3205_v21 }
 0x18c   : > { %v806_v40 = vrot.slane %v784_v33, %v3205_v21  ;;  %v813_v42 = vrot.slane %v785_v4, %v3205_v21  ;;  %v814_v10 = vcombine.high %v792_v34, %v792_v34  ;;  %v815_v43 = vcombine.high %v799_v35, %v799_v35 }
 0x18d   : > { %v978_v44 = vrot.slane %v792_v34, %v3205_v21  ;;  %v1285_v45 = vrot.slane %v799_v35, %v3205_v21  ;;  %v757_v46 = vrot.slane %v735_v37, %v3205_v21  ;;  %v764_v47 = vrot.slane %v736_v38, %v3205_v21 }
 0x18e   : > { %v816_v48 = vcombine.high %v806_v40, %v806_v40  ;;  %v817_v49 = vcombine.high %v813_v42, %v813_v42  ;;  %v992_v50 = vrot.slane %v806_v40, %v3205_v21  ;;  %v1006_v51 = vrot.slane %v814_v10, %v3205_v21 }
 0x18f   : > { %v3228_v52 = vrot.slane %v978_v44, %v3205_v21  ;;  %v1299_v53 = vrot.slane %v813_v42, %v3205_v21  ;;  %v1313_v54 = vrot.slane %v815_v43, %v3205_v21  ;;  %v3238_v58 = vrot.slane %v1285_v45, %v3205_v21 }
 0x190   : > { %v3233_v55 = vrot.slane %v992_v50, %v3205_v21  ;;  %v1013_v56 = vrot.slane %v1006_v51, %v3205_v21  ;;  %v1020_v57 = vrot.slane %v816_v48, %v3205_v21  ;;  %v1327_v60 = vrot.slane %v817_v49, %v3205_v21 }
 0x191   : > { %v1144_v29 = vunpack.c.l.b16 %v3228_v52  ;;  %v3242_v59 = vrot.slane %v1299_v53, %v3205_v21  ;;  %v1320_v9 = vrot.slane %v1313_v54, %v3205_v21  ;;  %v765_v61 = vcombine.high %v743_v39, %v743_v39 }
 0x192   : > { %v766_v62 = vcombine.high %v750_v2, %v750_v2  ;;  %v767_v63 = vcombine.high %v757_v46, %v757_v46  ;;  %v768_v0 = vcombine.high %v764_v47, %v764_v47  ;;  %v922_v41 = vrot.slane %v743_v39, %v3205_v21 }
 0x193   : > { %v1452_v36 = vunpack.c.l.b16 %v3242_v59  ;;  %v936_v6 = vrot.slane %v757_v46, %v3205_v21  ;;  %v1229_v7 = vrot.slane %v750_v2, %v3205_v21  ;;  %v1451_v8 = vunpack.c.l.b16 %v3238_v58 }
 0x194   : > { %v3252_v11 = vrot.slane %v765_v61, %v3205_v21  ;;  %v1243_v12 = vrot.slane %v764_v47, %v3205_v21  ;;  %v3256_v13 = vrot.slane %v766_v62, %v3205_v21  ;;  %v3259_v15 = vrot.slane %v922_v41, %v3205_v21 }
 0x195   : > { %v3262_v16 = vrot.slane %v936_v6, %v3205_v21  ;;  %v3265_v17 = vrot.slane %v767_v63, %v3205_v21  ;;  %v3268_v18 = vrot.slane %v1229_v7, %v3205_v21  ;;  %v3276_v22 = vrot.slane %v768_v0, %v3205_v21 }
 0x196   : > { %v957_v19 = vrot.slane %v3252_v11, %v3205_v21  ;;  %v3273_v20 = vrot.slane %v1243_v12, %v3205_v21  ;;  %v1334_v23 = vrot.slane %v1327_v60, %v3205_v21  ;;  %v1140_v24 = vunpack.c.l.b16 %v3259_v15 }
 0x197   : > { %v1264_v25 = vrot.slane %v3256_v13, %v3205_v21  ;;  %v2689_v26 = vpop.f32.mrb[4].mxu0  ;;  %v3282_v27 = vunpack.c.l.b16 %v1320_v9  ;;  %v1469_v28 = vrot.slane %v1452_v36, 7  ;;  %v1447_v30 = vunpack.c.l.b16 %v3268_v18 }
 0x198   : > { %v666_v31 = vadd.f32 %v2689_v26, %v3194_v5  ;;  %v657_v32 = vpop.f32.mrb[5].mxu0  ;;  %v3288_v14 = vunpack.c.l.b16 %v1334_v23  ;;  %v1027_v33 = vrot.slane %v1020_v57, %v3205_v21  ;;  %v1448_v4 = vunpack.c.l.b16 %v3273_v20 }
 0x199   : > { %v658_v34 = vadd.f32 %v657_v32, %v3194_v5  ;;  %v2690_v35 = vpop.f32.mrb[6].mxu0  ;;  %v1470_v37 = vsel %vm1157_vm4, %v1469_v28, %v1451_v8  ;;  %v1471_v38 = vrot.slane %v3282_v27, 6  ;;  %v1145_v42 = vunpack.c.l.b16 %v3233_v55 }
 0x19a   : > { %v669_v39 = vadd.f32 %v2690_v35, %v3194_v5  ;;  %v660_v2 = vpop.f32.mrb[7].mxu0  ;;  %v1473_v40 = vrot.slane %v3288_v14, 5  ;;  %v3298_v10 = vunpack.c.l.b16 %v1013_v56  ;;  %v678_v43 = vmax.f32 %v666_v31, 0.0 }
 0x19b   : > { %v661_v44 = vadd.f32 %v660_v2, %v3194_v5  ;;  %v1472_v45 = vsel %vm1160_vm5, %v1471_v38, %v1470_v37  ;;  %v3302_v46 = vunpack.c.l.b16 %v1027_v33  ;;  %v676_v47 = vmax.f32 %v658_v34, 0.0 }
 0x19c   : > { %v679_v48 = vmax.f32 %v669_v39, 0.0  ;;  %v1474_v49 = vsel %vm1163_vm6, %v1473_v40, %v1472_v45  ;;  %v1193_v50 = vrot.slane %v1144_v29, 1  ;;  %v1195_v54 = vrot.slane %v3298_v10, 7 }
 0x19d   : > { %v677_v51 = vmax.f32 %v661_v44, 0.0  ;;  %v1488_v53 = vpack.c.b16 %v1474_v49, %v1474_v49  ;;  %v1197_v55 = vrot.slane %v3302_v46, 6  ;;  %v1505_v58 = vrot.slane %v1451_v8, 1 }
 0x19e   : > { %v683_v5 = vpack.c.bf16 %v679_v48, %v678_v43  ;;  %v2558_v56 = vpack.c.bf16 %v679_v48, %v679_v48  ;;  %v1194_v57 = vsel %vm1157_vm4, %v1145_v42, %v1193_v50  ;;  %v3311_v61 = vrot.slane %v1145_v42, 7 }
 0x19f   : > { %v682_v9 = vpack.c.bf16 %v677_v51, %v676_v47  ;;  %v2557_v60 = vpack.c.bf16 %v677_v51, %v677_v51  ;;  %1493 = vrot.lane.b32.xlu0 %v1488_v53, %s2945_s14  ;;  %v1196_v62 = vsel %vm1160_vm5, %v1195_v54, %v1194_v57  ;;  %v1507_v6 = vrot.slane %v3282_v27, 7 }
 0x1a0   : > { %2635 = vst [vmem:[%s3207_s20 + $0x18] sm:$0xff] %v683_v5   ;;  %v874_v63 = vrot.slane %v683_v5, %v3205_v21  ;;  %v881_v0 = vrot.slane %v2558_v56, %v3205_v21  ;;  %v1198_v41 = vsel %vm1163_vm6, %v1197_v55, %v1196_v62  ;;  %v1506_v23 = vsel %vm1157_vm4, %v1452_v36, %v1505_v58 }
 0x1a1   : > { %2634 = vst [vmem:[%s3207_s20 + $0x10] sm:$0xff] %v682_v9   ;;  %v825_v7 = vrot.slane %v682_v9, %v3205_v21  ;;  %v832_v8 = vrot.slane %v2557_v60, %v3205_v21  ;;  %v1212_v12 = vpack.c.b16 %v1198_v41, %v1198_v41  ;;  %v1508_v5 = vsel %vm1160_vm5, %v1507_v6, %v1506_v23  ;;  %s2956_s20 = smov [#allocation4]  }
 0x1a2   : > { %v882_v26 = vcombine.high %v874_v63, %v874_v63  ;;  %v883_v28 = vcombine.high %v881_v0, %v881_v0  ;;  %v890_v31 = vrot.slane %v874_v63, %v3205_v21  ;;  %v897_v32 = vrot.slane %v881_v0, %v3205_v21 }
 0x1a3   : > { %v833_v33 = vcombine.high %v825_v7, %v825_v7  ;;  %v834_v34 = vcombine.high %v832_v8, %v832_v8  ;;  %v841_v27 = vrot.slane %v825_v7, %v3205_v21  ;;  %v848_v35 = vrot.slane %v832_v8, %v3205_v21  ;;  %1217 = vrot.lane.b32.xlu1 %v1212_v12, %s2948_s21 }
 0x1a4   : > { %v904_v37 = vrot.slane %v882_v26, %v3205_v21  ;;  %v911_v59 = vrot.slane %v883_v28, %v3205_v21  ;;  %v912_v36 = vcombine.high %v890_v31, %v890_v31  ;;  %v913_v38 = vcombine.high %v897_v32, %v897_v32 }
 0x1a5   : > { %v1090_v39 = vrot.slane %v890_v31, %v3205_v21  ;;  %v1397_v2 = vrot.slane %v897_v32, %v3205_v21  ;;  %v855_v40 = vrot.slane %v833_v33, %v3205_v21  ;;  %v862_v42 = vrot.slane %v834_v34, %v3205_v21 }
 0x1a6   : > { %v914_v43 = vcombine.high %v904_v37, %v904_v37  ;;  %v915_v44 = vcombine.high %v911_v59, %v911_v59  ;;  %v1104_v45 = vrot.slane %v904_v37, %v3205_v21  ;;  %v3338_v47 = vrot.slane %v912_v36, %v3205_v21 }
 0x1a7   : > { %v3341_v48 = vrot.slane %v1090_v39, %v3205_v21  ;;  %v3344_v49 = vrot.slane %v1397_v2, %v3205_v21  ;;  %v1411_v50 = vrot.slane %v911_v59, %v3205_v21  ;;  %v3348_v51 = vrot.slane %v913_v38, %v3205_v21 }
 0x1a8   : > { %v3351_v53 = vrot.slane %v1104_v45, %v3205_v21  ;;  %v1125_v54 = vrot.slane %v3338_v47, %v3205_v21  ;;  %v3356_v55 = vrot.slane %v914_v43, %v3205_v21  ;;  %v3366_v9 = vrot.slane %v915_v44, %v3205_v21 }
 0x1a9   : > { %v1152_v56 = vunpack.c.l.b16 %v3341_v48  ;;  %v3361_v57 = vrot.slane %v1411_v50, %v3205_v21  ;;  %v1432_v58 = vrot.slane %v3348_v51, %v3205_v21  ;;  %v863_v60 = vcombine.high %v841_v27, %v841_v27 }
 0x1aa   : > { %v864_v62 = vcombine.high %v848_v35, %v848_v35  ;;  %v865_v63 = vcombine.high %v855_v40, %v855_v40  ;;  %v866_v0 = vcombine.high %v862_v42, %v862_v42  ;;  %v1459_v41 = vunpack.c.l.b16 %v3344_v49 }
 0x1ab   : > { %v1034_v7 = vrot.slane %v841_v27, %v3205_v21  ;;  %v1048_v6 = vrot.slane %v855_v40, %v3205_v21  ;;  %v1341_v8 = vrot.slane %v848_v35, %v3205_v21  ;;  %v1460_v12 = vunpack.c.l.b16 %v3361_v57 }
 0x1ac   : > { %v3374_v23 = vrot.slane %v863_v60, %v3205_v21  ;;  %v1355_v26 = vrot.slane %v862_v42, %v3205_v21  ;;  %v1369_v28 = vrot.slane %v864_v62, %v3205_v21  ;;  %v3385_v33 = vrot.slane %v865_v63, %v3205_v21 }
 0x1ad   : > { %v3379_v31 = vrot.slane %v1034_v7, %v3205_v21  ;;  %v3382_v32 = vrot.slane %v1048_v6, %v3205_v21  ;;  %v3388_v34 = vrot.slane %v1341_v8, %v3205_v21  ;;  %v1383_v37 = vrot.slane %v866_v0, %v3205_v21 }
 0x1ae   : > { %v1069_v27 = vrot.slane %v3374_v23, %v3205_v21  ;;  %v3393_v35 = vrot.slane %v1355_v26, %v3205_v21  ;;  %v1509_v59 = vrot.slane %v3288_v14, 6  ;;  %v1376_v38 = vrot.slane %v1369_v28, %v3205_v21 }
 0x1af   : > { %v1148_v36 = vunpack.c.l.b16 %v3379_v31  ;;  %v1278_v39 = vrot.slane %v3276_v22, %v3205_v21  ;;  %v1449_v2 = vunpack.c.l.b16 %v1264_v25  ;;  %v1455_v40 = vunpack.c.l.b16 %v3388_v34 }
 0x1b0   : > { %v1510_v42 = vsel %vm1163_vm6, %v1509_v59, %v1508_v5  ;;  %v1463_v43 = vrot.slane %v1448_v4, 7  ;;  %v1499_v14 = vrot.slane %v1447_v30, 1  ;;  %v971_v25 = vrot.slane %v3265_v17, %v3205_v21 }
 0x1b1   : > { %v1524_v44 = vpack.c.b16 %v1510_v42, %v1510_v42  ;;  %v1450_v45 = vunpack.c.l.b16 %v1278_v39  ;;  %v1465_v47 = vrot.slane %v1449_v2, 6  ;;  %v1501_v50 = vrot.slane %v1449_v2, 7 }
 0x1b2   : > { %v1464_v22 = vsel %vm1157_vm4, %v1463_v43, %v1447_v30  ;;  %v1500_v13 = vsel %vm1157_vm4, %v1448_v4, %v1499_v14  ;;  %v1141_v5 = vunpack.c.l.b16 %v3262_v16  ;;  %v1456_v30 = vunpack.c.l.b16 %v3393_v35 }
 0x1b3   : > { %1529 = vrot.lane.b32.xlu0 %v1524_v44, %s2949_s23  ;;  %v1466_v60 = vsel %vm1160_vm5, %v1465_v47, %v1464_v22  ;;  %v1467_v62 = vrot.slane %v1450_v45, 5  ;;  %v1502_v63 = vsel %vm1160_vm5, %v1501_v50, %v1500_v13  ;;  %v1503_v18 = vrot.slane %v1450_v45, 6 }
 0x1b4   : > { %v3426_v20 = vunpack.c.l.b16 %v957_v19  ;;  %v3428_v4 = vunpack.c.l.b16 %v971_v25  ;;  %v1187_v16 = vrot.slane %v1140_v24, 1  ;;  %v3434_v7 = vrot.slane %v1141_v5, 7 }
 0x1b5   : > { %v1468_v17 = vsel %vm1163_vm6, %v1467_v62, %v1466_v60  ;;  %v1504_v0 = vsel %vm1163_vm6, %v1503_v18, %v1502_v63  ;;  %v1139_v6 = vrot.slane %v3356_v55, %v3205_v21  ;;  %v1153_v19 = vunpack.c.l.b16 %v3351_v53 }
 0x1b6   : > { %v1487_v8 = vpack.c.b16 %v1468_v17, %v1468_v17  ;;  %v1188_v26 = vsel %vm1157_vm4, %v1141_v5, %v1187_v16  ;;  %v1189_v11 = vrot.slane %v3426_v20, 7  ;;  %v1523_v28 = vpack.c.b16 %v1504_v0, %v1504_v0 }
 0x1b7   : > { %v1191_v35 = vrot.slane %v3428_v4, 6  ;;  %v3442_v59 = vunpack.c.l.b16 %v1125_v54  ;;  %v3444_v39 = vunpack.c.l.b16 %v1139_v6  ;;  %v1205_v55 = vrot.slane %v1152_v56, 1 }
 0x1b8   : > { %1491 = vrot.lane.b32.xlu1 %v1487_v8, %s2945_s14  ;;  %v1190_v2 = vsel %vm1160_vm5, %v1189_v11, %v1188_v26  ;;  %v1390_v42 = vrot.slane %v1383_v37, %v3205_v21  ;;  %v1457_v43 = vunpack.c.l.b16 %v1376_v38  ;;  %v1475_v54 = vrot.slane %v1456_v30, 7 }
 0x1b9   : > { %v1192_v14 = vsel %vm1163_vm6, %v1191_v35, %v1190_v2  ;;  %v1207_v53 = vrot.slane %v3442_v59, 7  ;;  %v1209_v44 = vrot.slane %v3444_v39, 6  ;;  %v1206_v47 = vsel %vm1157_vm4, %v1153_v19, %v1205_v55 }
 0x1ba   : > { %v1211_v45 = vpack.c.b16 %v1192_v14, %v1192_v14  ;;  %v1458_v50 = vunpack.c.l.b16 %v1390_v42  ;;  %v1477_v22 = vrot.slane %v1457_v43, 6  ;;  %v1476_v25 = vsel %vm1157_vm4, %v1475_v54, %v1455_v40 }
 0x1bb   : > { %v1208_v13 = vsel %vm1160_vm5, %v1207_v53, %v1206_v47  ;;  %v1083_v37 = vrot.slane %v3385_v33, %v3205_v21  ;;  %v1149_v38 = vunpack.c.l.b16 %v3382_v32  ;;  %v3469_v63 = vunpack.c.l.b16 %v1069_v27 }
 0x1bc   : > { %1527 = vrot.lane.b32.xlu1 %v1523_v28, %s2949_s23  ;;  %1215 = vrot.lane.b32.xlu0 %v1211_v45, %s2948_s21  ;;  %v1210_v5 = vsel %vm1163_vm6, %v1209_v44, %v1208_v13  ;;  %v1478_v60 = vsel %vm1160_vm5, %v1477_v22, %v1476_v25  ;;  %v1479_v62 = vrot.slane %v1458_v50, 5  ;;  %v1177_v18 = vrot.slane %v1153_v19, 7 }
 0x1bd   : > { %v1214_v16 = vpack.c.b16 %v1210_v5, %v1210_v5  ;;  %v3471_v17 = vunpack.c.l.b16 %v1083_v37  ;;  %v1199_v32 = vrot.slane %v1148_v36, 1  ;;  %v1201_v0 = vrot.slane %v3469_v63, 7 }
 0x1be   : > { %v1480_v33 = vsel %vm1163_vm6, %v1479_v62, %v1478_v60  ;;  %v1511_v6 = vrot.slane %v1455_v40, 1  ;;  %v1513_v8 = vrot.slane %v1457_v43, 7  ;;  %v1515_v11 = vrot.slane %v1458_v50, 6 }
 0x1bf   : > { %v1489_v26 = vpack.c.b16 %v1480_v33, %v1480_v33  ;;  %v1200_v23 = vsel %vm1157_vm4, %v1149_v38, %v1199_v32  ;;  %v1203_v27 = vrot.slane %v3471_v17, 6  ;;  %v1446_v35 = vrot.slane %v3366_v9, %v3205_v21 }
 0x1c0   : > { %1221 = vrot.lane.b32.xlu0 %v1214_v16, %s2948_s21  ;;  %v1202_v19 = vsel %vm1160_vm5, %v1201_v0, %v1200_v23  ;;  %v1512_v28 = vsel %vm1157_vm4, %v1456_v30, %v1511_v6  ;;  %v1461_v34 = vunpack.c.l.b16 %v1432_v58  ;;  %v1481_v55 = vrot.slane %v1460_v12, 7 }
 0x1c1   : > { %1495 = vrot.lane.b32.xlu1 %v1489_v26, %s2945_s14  ;;  %v1204_v40 = vsel %vm1163_vm6, %v1203_v27, %v1202_v19  ;;  %v1514_v2 = vsel %vm1160_vm5, %v1513_v8, %v1512_v28  ;;  %v1517_v42 = vrot.slane %v1459_v41, 1  ;;  %v1462_v9 = vunpack.c.l.b16 %v1446_v35 }
 0x1c2   : > { %v1213_v30 = vpack.c.b16 %v1204_v40, %v1204_v40  ;;  %v1516_v43 = vsel %vm1163_vm6, %v1515_v11, %v1514_v2  ;;  %v1483_v14 = vrot.slane %v1461_v34, 6  ;;  %v1482_v51 = vsel %vm1157_vm4, %v1481_v55, %v1459_v41 }
 0x1c3   : > { %v1525_v53 = vpack.c.b16 %v1516_v43, %v1516_v43  ;;  %v1518_v58 = vsel %vm1157_vm4, %v1460_v12, %v1517_v42  ;;  %v1519_v44 = vrot.slane %v1461_v34, 7  ;;  %v1485_v45 = vrot.slane %v1462_v9, 5 }
 0x1c4   : > { %1219 = vrot.lane.b32.xlu0 %v1213_v30, %s2948_s21  ;;  %v1484_v54 = vsel %vm1160_vm5, %v1483_v14, %v1482_v51  ;;  %v1521_v47 = vrot.slane %v1462_v9, 6  ;;  %v1166_v50 = vsel %vm1157_vm4, %v3311_v61, %v1144_v29  ;;  %v1171_v22 = vrot.slane %v1149_v38, 7 }
 0x1c5   : > { %1531 = vrot.lane.b32.xlu1 %v1525_v53, %s2949_s23  ;;  %v1520_v49 = vsel %vm1160_vm5, %v1519_v44, %v1518_v58  ;;  %v1167_v57 = vrot.slane %v3298_v10, 6  ;;  %v1169_v41 = vrot.slane %v3302_v46, 5  ;;  %v1486_v12 = vsel %vm1163_vm6, %v1485_v45, %v1484_v54 }
 0x1c6   : > { %v1522_v13 = vsel %vm1163_vm6, %v1521_v47, %v1520_v49  ;;  %v1158_v52 = vsel %vm1157_vm4, %v3434_v7, %v1140_v24  ;;  %v1159_v29 = vrot.slane %v3426_v20, 6  ;;  %v1490_v61 = vpack.c.b16 %v1486_v12, %v1486_v12  ;;  %v2795_v47 = vld [vmem:[%s3889_s2] sm:$0xff]   ;;  %v2814_v24 = vld [vmem:[%s3890_s3 + $0x28] sm:$0xff]  }
 0x1c7   : > { %v1526_v25 = vpack.c.b16 %v1522_v13, %v1522_v13  ;;  %v1168_v37 = vsel %vm1160_vm5, %v1167_v57, %v1166_v50  ;;  %v1162_v38 = vrot.slane %v3428_v4, 5  ;;  %v1178_v20 = vsel %vm1157_vm4, %v1177_v18, %v1152_v56 }
 0x1c8   : > { %v1170_v10 = vsel %vm1163_vm6, %v1169_v41, %v1168_v37  ;;  %v1161_v46 = vsel %vm1160_vm5, %v1159_v29, %v1158_v52  ;;  %1497 = vrot.lane.b32.xlu0 %v1490_v61, %s2945_s14  ;;  %v2950_v4 = vmov 0   ;;  %v1179_v5 = vrot.slane %v3442_v59, 6  ;;  %v2796_v29 = vld [vmem:[%s3889_s2 + $0x8] sm:$0xff]  }
 0x1c9   : > { %1533 = vrot.lane.b32.xlu1 %v1526_v25, %s2949_s23  ;;  %v1164_v15 = vsel %vm1163_vm6, %v1162_v38, %v1161_v46  ;;  %v1568_v7 = vrot.slane %v2950_v4, 7  ;;  %v1181_v60 = vrot.slane %v3444_v39, 5  ;;  %v1172_v62 = vsel %vm1157_vm4, %v1171_v22, %v1148_v36  ;;  %v2797_v46 = vld [vmem:[%s3889_s2 + $0x10] sm:$0xff]  }
 0x1ca   : > { %v1173_v16 = vrot.slane %v3469_v63, 6  ;;  %v1175_v32 = vrot.slane %v3471_v17, 5  ;;  %v1180_v48 = vsel %vm1160_vm5, %v1179_v5, %v1178_v20  ;;  %v1184_v6 = vpack.c.b16 %v1170_v10, %v1170_v10 }
 0x1cb   : > { %v3543_v33 = vsel %vm3527_vm9, 0, %v1568_v7  ;;  %v3549_v39 = vsel %vm1163_vm6, %v1181_v60, %v1180_v48  ;;  %v1183_v40 = vpack.c.b16 %v1164_v15, %v1164_v15  ;;  %v2953_v49 = vmov 0.0  }
 0x1cc   : > { %v1610_v56 = vshrl.u32 %v3543_v33, 16  ;;  %v1612_v59 = vshll.u32 %v3543_v33, 16  ;;  %v1174_v31 = vsel %vm1160_vm5, %v1173_v16, %v1172_v62  ;;  %2691 = vmatprep.subr.bf16.mxu1 %v2953_v49  ;;  %v1186_v37 = vpack.c.b16 %v3549_v39, %v3549_v39  ;;  %2707 = vmatprep.mubr.msk.bf16.mxu1 %vm2954_vm12, %v2953_v49 }
 0x1cd   : > { %v1176_v36 = vsel %vm1163_vm6, %v1175_v32, %v1174_v31  ;;  %2692 = vmatpush3.bf16.msra.mxu1 %v2795_v47 }
 0x1ce   : > { %v1614_v63 = vrot.slane %v1612_v59, 1  ;;  %v1185_v57 = vpack.c.b16 %v1176_v36, %v1176_v36  ;;  %2693 = vmatprep.subr.bf16.mxu1 %v2953_v49  ;;  %v2798_v59 = vld [vmem:[%s3889_s2 + $0x18] sm:$0xff]  }
 0x1d0   : > { %v3553_v18 = vor.u32 %v1614_v63, %v1610_v56 }
 0x1d1   : > { %2694 = vmatpush3.bf16.msra.mxu1 %v2796_v29 }
 0x1d2   : > { %1637 = vrot.lane.b32.xlu0 %v3553_v18, %s2944_s22  ;;  %2695 = vmatprep.subr.bf16.mxu1 %v2953_v49 }
 0x1d5   : > { %2696 = vmatpush3.bf16.msra.mxu1 %v2797_v46 }
 0x1d6   : > { %2697 = vmatprep.subr.bf16.mxu1 %v2953_v49 }
 0x1d9   : > { %2698 = vmatpush3.bf16.msra.mxu1 %v2798_v59 }
 0x1da   : > { %2699 = vmatprep.subr.bf16.mxu1 %v2953_v49 }
 0x211   : > { %v1494_v0 = vpop.permute.xlu0 %1493 }
 0x215   : > { %v1218_v17 = vpop.permute.xlu1 %1217 }
 0x216   : > { %v1541_v8 = vsel %vm1535_vm10, %v1184_v6, %v1218_v17 }
 0x217   : > { %v1551_v26 = vsel %vm479_vm0, %v1541_v8, %v1494_v0  ;;  %v2799_v8 = vld [vmem:[%s3889_s2 + $0x20] sm:$0xff]  }
 0x218   : > { %2700 = vmatpush3.bf16.msra.mxu1 %v2799_v8 }
 0x219   : > { %2701 = vmatprep.subr.bf16.mxu1 %v2953_v49 }
 0x225   : > { %v1530_v23 = vpop.permute.xlu0 %1529 }
 0x226   : > { %v1560_v27 = vsel %vm1556_vm11, %v1551_v26, %v1530_v23 }
 0x227   : > { %v1578_v11 = vshrl.u32 %v1560_v27, 16  ;;  %v1581_v28 = vshll.u32 %v1560_v27, 16 }
 0x229   : > { %v1580_v19 = vrot.slane %v1578_v11, 7 }
 0x22a   : > { %v1492_v35 = vpop.permute.xlu1 %1491 }
 0x22b   : > { %v1583_v34 = vor.u32 %v1581_v28, %v1580_v19  ;;  %v2800_v28 = vld [vmem:[%s3889_s2 + $0x28] sm:$0xff]  }
 0x22c   : > { %2702 = vmatpush3.bf16.msra.mxu1 %v2800_v28 }
 0x22d   : > { %v3562_v2 = vsel %vm3527_vm9, 0, %v1583_v34  ;;  %2703 = vmatprep.subr.bf16.mxu1 %v2953_v49 }
 0x22e   : > { %v1216_v55 = vpop.permute.xlu0 %1215  ;;  %1651 = vrot.lane.b32.xlu1 %v3562_v2, %s3896_s8  ;;  %v1626_v42 = vshll.u32 %v3562_v2, 16  ;;  %v1528_v30 = vpop.permute.xlu1 %1527  ;;  %v1624_v14 = vshrl.u32 %v3562_v2, 16 }
 0x22f   : > { %v1538_v43 = vsel %vm1535_vm10, %v1183_v40, %v1216_v55  ;;  %v2801_v40 = vld [vmem:[%s3889_s2 + $0x30] sm:$0xff]  }
 0x230   : > { %v1549_v9 = vsel %vm479_vm0, %v1538_v43, %v1492_v35  ;;  %v1628_v53 = vrot.slane %v1626_v42, 1  ;;  %2704 = vmatpush3.bf16.msra.mxu1 %v2801_v40  ;;  %v2802_v42 = vld [vmem:[%s3889_s2 + $0x38] sm:$0xff]  }
 0x231   : > { %v1558_v51 = vsel %vm1556_vm11, %v1549_v9, %v1528_v30  ;;  %2705 = vmatprep.subr.bf16.mxu1 %v2953_v49 }
 0x232   : > { %v1572_v58 = vshrl.u32 %v1558_v51, 16  ;;  %v1629_v44 = vor.u32 %v1628_v53, %v1624_v14  ;;  %v1222_v54 = vpop.permute.xlu0 %1221  ;;  %v1575_v50 = vshll.u32 %v1558_v51, 16 }
 0x233   : > { %v1496_v45 = vpop.permute.xlu1 %1495  ;;  %v1547_v20 = vsel %vm1535_vm10, %v1186_v37, %v1222_v54  ;;  %v2955_v54 = vmov 1983009808  }
 0x234   : > { %1666 = vrot.lane.b32.xlu1 %v1629_v44, %s2952_s16  ;;  %v1574_v22 = vrot.slane %v1572_v58, 7  ;;  %2706 = vmatpush3.bf16.msra.mxu1 %v2802_v42 }
 0x236   : > { %v1577_v41 = vor.u32 %v1575_v50, %v1574_v22  ;;  %v1220_v12 = vpop.permute.xlu0 %1219 }
 0x237   : > { %v1544_v13 = vsel %vm1535_vm10, %v1185_v57, %v1220_v12  ;;  %v1532_v52 = vpop.permute.xlu1 %1531 }
 0x238   : > { %v3583_v61 = vsel %vm3527_vm9, 0, %v1577_v41  ;;  %v1553_v25 = vsel %vm479_vm0, %v1544_v13, %v1496_v45  ;;  %v1724_v45 = vunpack.c.l.s4 %v2955_v54 }
 0x239   : > { %1649 = vrot.lane.b32.xlu0 %v3583_v61, %s3896_s8  ;;  %v1619_v38 = vshll.u32 %v3583_v61, 16  ;;  %v1562_v10 = vsel %vm1556_vm11, %v1553_v25, %v1532_v52  ;;  %v1617_v4 = vshrl.u32 %v3583_v61, 16 }
 0x23a   : > { %v1584_v15 = vshrl.u32 %v1562_v10, 16  ;;  %v1498_v5 = vpop.permute.xlu0 %1497  ;;  %v1587_v16 = vshll.u32 %v1562_v10, 16  ;;  %v1725_v41 = vunpack.c.0.s8 %v1724_v45 }
 0x23b   : > { %v1621_v7 = vrot.slane %v1619_v38, 1  ;;  %v1534_v60 = vpop.permute.xlu1 %1533  ;;  %v1555_v32 = vsel %vm479_vm0, %v1547_v20, %v1498_v5 }
 0x23c   : > { %v1586_v62 = vrot.slane %v1584_v15, 7  ;;  %v1564_v56 = vsel %vm1556_vm11, %v1555_v32, %v1534_v60  ;;  %v1728_v37 = vsub.s32 %v1725_v41, %v3185_v1 }
 0x23d   : > { %1641 = vrot.lane.b32.xlu0 %v1629_v44, %s2944_s22  ;;  %v1622_v48 = vor.u32 %v1621_v7, %v1617_v4  ;;  %v1590_v31 = vshrl.u32 %v1564_v56, 16  ;;  %v1593_v63 = vshll.u32 %v1564_v56, 16 }
 0x23e   : > { %v1589_v39 = vor.u32 %v1587_v16, %v1586_v62 }
 0x23f   : > { %1639 = vrot.lane.b32.xlu1 %v1622_v48, %s2944_s22  ;;  %v1592_v36 = vrot.slane %v1590_v31, 7 }
 0x240   : > { %v1607_v17 = vsel %vm3527_vm9, 0, %v1589_v39 }
 0x241   : > { %1664 = vrot.lane.b32.xlu0 %v1622_v48, %s2952_s16  ;;  %v1633_v0 = vshll.u32 %v1607_v17, 16  ;;  %v1595_v6 = vor.u32 %v1593_v63, %v1592_v36  ;;  %v1631_v26 = vshrl.u32 %v1607_v17, 16 }
 0x243   : > { %v1635_v23 = vrot.slane %v1633_v0, 1  ;;  %v1608_v27 = vsel %vm3527_vm9, 0, %v1595_v6 }
 0x244   : > { %1655 = vrot.lane.b32.xlu1 %v1608_v27, %s3896_s8  ;;  %v1660_v11 = vshll.u32 %v1608_v27, 16  ;;  %v1658_v34 = vshrl.u32 %v1608_v27, 16  ;;  %v1638_v30 = vpop.permute.xlu0 %1637 }
 0x245   : > { %1653 = vrot.lane.b32.xlu0 %v1607_v17, %s3896_s8  ;;  %v1636_v19 = vor.u32 %v1635_v23, %v1631_v26  ;;  %v1673_v50 = vsel %vm504_vm1, %v3543_v33, %v1638_v30 }
 0x246   : > { %v1662_v35 = vrot.slane %v1660_v11, 1 }
 0x248   : > { %1643 = vrot.lane.b32.xlu1 %v1636_v19, %s2944_s22  ;;  %v1663_v55 = vor.u32 %v1662_v35, %v1658_v34 }
 0x249   : > { %1668 = vrot.lane.b32.xlu0 %v1636_v19, %s2952_s16 }
 0x24c   : > { %1670 = vrot.lane.b32.xlu1 %v1663_v55, %s2952_s16  ;;  %s2515_s16 = sshll.u32 %s3197_s18, 3 }
 0x24d   : > { %s3652_s21 = scalar_lea.vmem [#allocation4], %s2515_s16  ;;  %s3775_s16 = scalar_lea.hbm %s3893_s6, %s2607_s19 }
 0x24e   : > { %s2374_s13 = sshll.u32 %s3652_s21, 4  ;;  %s3768_s13 = int_to_ptr.vmem [resolvable:$true] %s2374_s13 }
 0x24f   : > { %s2820_s23 = scalar_lea.vmem %s3768_s13, 128 }
 0x250   : > { %p2821_p11 = scmp.ne.s32.totalorder %s3768_s13, %s2820_s23 }
 0x252   : > { %p2822_p12 = pnand %p2821_p11, %p3040_p5 }
 0x254   : > { %p2823_p13 = pneg %p2822_p12 }
 0x2a0   : > { %v1652_v43 = vpop.permute.xlu1 %1651 }
 0x2a6   : > { %v1667_v14 = vpop.permute.xlu1 %1666 }
 0x2ab   : > { %v1650_v9 = vpop.permute.xlu0 %1649 }
 0x2ac   : > { %v1681_v57 = vsel %vm594_vm3, %v1673_v50, %v1650_v9 }
 0x2af   : > { %v1642_v53 = vpop.permute.xlu0 %1641 }
 0x2b0   : > { %v1677_v25 = vsel %vm504_vm1, %v3562_v2, %v1642_v53  ;;  %v1715_v2 = vsub.s32 1, %v3185_v1 }
 0x2b1   : > { %v1640_v51 = vpop.permute.xlu1 %1639 }
 0x2b2   : > { %v1675_v44 = vsel %vm504_vm1, %v3583_v61, %v1640_v51  ;;  %v1716_v16 = vrot.slane %v3191_v3, %v1715_v2 }
 0x2b3   : > { %v1665_v58 = vpop.permute.xlu0 %1664  ;;  %v1683_v22 = vsel %vm594_vm3, %v1675_v44, %v1652_v43 }
 0x2b4   : > { %v1692_v13 = vsel %vm1688_vm13, %v1683_v22, %v1667_v14  ;;  %v1690_v52 = vsel %vm1688_vm13, %v1681_v57, %v1665_v58 }
 0x2b5   : > { %v1721_v38 = vcombine.low %v1690_v52, %v1692_v13 }
 0x2b6   : > { %v1656_v47 = vpop.permute.xlu1 %1655 }
 0x2b7   : > { %v1654_v49 = vpop.permute.xlu0 %1653  ;;  %v1729_v5 = vrot.slane %v1721_v38, %v1728_v37 }
 0x2b8   : > { %v1685_v10 = vsel %vm594_vm3, %v1677_v25, %v1654_v49 }
 0x2ba   : > { %v1644_v12 = vpop.permute.xlu1 %1643 }
 0x2bb   : > { %v1679_v29 = vsel %vm504_vm1, %v1607_v17, %v1644_v12  ;;  %v1669_v61 = vpop.permute.xlu0 %1668 }
 0x2bc   : > { %v1687_v46 = vsel %vm594_vm3, %v1679_v29, %v1656_v47  ;;  %v1694_v20 = vsel %vm1688_vm13, %v1685_v10, %v1669_v61 }
 0x2be   : > { %v1671_v15 = vpop.permute.xlu1 %1670 }
 0x2bf   : > { %v1696_v4 = vsel %vm1688_vm13, %v1687_v46, %v1671_v15 }
 0x2c0   : > { %v1722_v7 = vcombine.low %v1694_v20, %v1696_v4 }
 0x2c2   : > { %v1736_v60 = vrot.slane %v1722_v7, %v1728_v37 }
 0x2c4   : > { %v1737_v62 = vcombine.low %v1729_v5, %v1736_v60 }
 0x2c6   : > { %2708 = vmatmul.mubr.bf16.vlgmr.msra.gmra.mrb[0].mxu1 %v1737_v62 }
 0x399   : > { %v1821_v32 = vpop.f32.mrb[0].mxu1 }
 0x39a   : > { %v1822_v48 = vadd.f32 %v1821_v32, %v1716_v16  ;;  %v2709_v56 = vpop.f32.mrb[1].mxu1 }
 0x39b   : > { %v1824_v59 = vpop.f32.mrb[2].mxu1 }
 0x39c   : > { %v1825_v39 = vadd.f32 %v1824_v59, %v1716_v16  ;;  %v2710_v31 = vpop.f32.mrb[3].mxu1  ;;  %v1828_v36 = vmax.f32 %v1822_v48, 0.0 }
 0x39e   : > { %v1829_v63 = vmax.f32 %v1825_v39, 0.0 }
 0x3a0   : > { %v1830_v17 = vpack.c.bf16 %v1829_v63, %v1828_v36  ;;  %v2569_v0 = vpack.c.bf16 %v1829_v63, %v1829_v63 }
 0x3a2   : > { %2632 = vst [vmem:[%s3652_s21] sm:$0xff] %v1830_v17   ;;  %v1847_v6 = vrot.slane %v1830_v17, %v3205_v21  ;;  %v1854_v8 = vrot.slane %v2569_v0, %v3205_v21  ;;  %v2803_v0 = vld [vmem:[%s3890_s3 + $0x40] sm:$0xff]   ;;  %s2824_s21 = sshll.u32 %s2956_s20, 4  ;;  %s2825_s21 = int_to_ptr.vmem [resolvable:$false] %s2824_s21 }
 0x3a3   : > { %2653 = vmatprep.subr.bf16.mxu0 %v2803_v0  ;;  %p2827_p0 = scmp.lt.s32.totalorder %s3768_s13, %s2825_s21 }
 0x3a4   : > { %v1855_v3 = vcombine.high %v1847_v6, %v1847_v6  ;;  %v1856_v26 = vcombine.high %v1854_v8, %v1854_v8  ;;  %v1863_v23 = vrot.slane %v1847_v6, %v3205_v21  ;;  %v1870_v27 = vrot.slane %v1854_v8, %v3205_v21  ;;  %v2804_v6 = vld [vmem:[%s3890_s3] sm:$0xff]   ;;  %v2805_v8 = vld [vmem:[%s3890_s3 + $0x48] sm:$0xff]  }
 0x3a5   : > { %2654 = vmatpush3.bf16.msra.mxu0 %v2804_v6 }
 0x3a6   : > { %v1877_v11 = vrot.slane %v1855_v3, %v3205_v21  ;;  %v1884_v19 = vrot.slane %v1856_v26, %v3205_v21  ;;  %v1885_v28 = vcombine.high %v1863_v23, %v1863_v23  ;;  %v1886_v35 = vcombine.high %v1870_v27, %v1870_v27  ;;  %v2806_v3 = vld [vmem:[%s3890_s3 + $0x8] sm:$0xff]   ;;  %2655 = vmatprep.subr.bf16.mxu0 %v2805_v8  ;;  %v2807_v26 = vld [vmem:[%s3890_s3 + $0x50] sm:$0xff]  }
 0x3a7   : > { %v1895_v34 = vrot.slane %v1863_v23, %v3205_v21  ;;  %v1923_v40 = vrot.slane %v1870_v27, %v3205_v21  ;;  %v2808_v23 = vld [vmem:[%s3890_s3 + $0x10] sm:$0xff]   ;;  %v2810_v27 = vld [vmem:[%s3890_s3 + $0x18] sm:$0xff]  }
 0x3a8   : > { %v1887_v55 = vcombine.high %v1877_v11, %v1877_v11  ;;  %v1888_v42 = vcombine.high %v1884_v19, %v1884_v19  ;;  %v1909_v30 = vrot.slane %v1877_v11, %v3205_v21  ;;  %v1937_v43 = vrot.slane %v1884_v19, %v3205_v21 }
 0x3a9   : > { %v1902_v9 = vrot.slane %v1895_v34, %v3205_v21  ;;  %v1930_v14 = vrot.slane %v1923_v40, %v3205_v21  ;;  %v1971_v53 = vrot.slane %v1885_v28, %v3205_v21  ;;  %v1999_v51 = vrot.slane %v1886_v35, %v3205_v21  ;;  %2656 = vmatpush3.bf16.msra.mxu0 %v2806_v3 }
 0x3aa   : > { %v1985_v58 = vrot.slane %v1887_v55, %v3205_v21  ;;  %v2013_v44 = vrot.slane %v1888_v42, %v3205_v21  ;;  %v1944_v54 = vrot.slane %v1937_v43, %v3205_v21  ;;  %v1916_v45 = vrot.slane %v1909_v30, %v3205_v21  ;;  %2657 = vmatprep.subr.bf16.mxu0 %v2807_v26 }
 0x3ab   : > { %v1947_v47 = vunpack.c.l.b16 %v1930_v14  ;;  %v1945_v50 = vunpack.c.l.b16 %v1902_v9  ;;  %v2006_v22 = vrot.slane %v1999_v51, %v3205_v21  ;;  %v1978_v49 = vrot.slane %v1971_v53, %v3205_v21 }
 0x3ac   : > { %v1948_v57 = vunpack.c.l.b16 %v1944_v54  ;;  %v1946_v41 = vunpack.c.l.b16 %v1916_v45  ;;  %v2020_v12 = vrot.slane %v2013_v44, %v3205_v21  ;;  %v1992_v13 = vrot.slane %v1985_v58, %v3205_v21 }
 0x3ad   : > { %v1957_v52 = vrot.slane %v1947_v47, 1  ;;  %v1955_v29 = vrot.slane %v1945_v50, 1  ;;  %v2023_v61 = vunpack.c.l.b16 %v2006_v22  ;;  %v2021_v25 = vunpack.c.l.b16 %v1978_v49  ;;  %2658 = vmatpush3.bf16.msra.mxu0 %v2808_v23 }
 0x3ae   : > { %v1951_v37 = vrot.slane %v1948_v57, 7  ;;  %v1949_v38 = vrot.slane %v1946_v41, 7  ;;  %v2024_v10 = vunpack.c.l.b16 %v2020_v12  ;;  %v2022_v46 = vunpack.c.l.b16 %v1992_v13 }
 0x3af   : > { %v1958_v15 = vsel %vm1157_vm4, %v1948_v57, %v1957_v52  ;;  %v1956_v20 = vsel %vm1157_vm4, %v1946_v41, %v1955_v29  ;;  %v2037_v62 = vrot.slane %v2023_v61, 1  ;;  %v2035_v2 = vrot.slane %v2021_v25, 1  ;;  %v2811_v52 = vld [vmem:[%s3890_s3 + $0x60] sm:$0xff]  }
 0x3b0   : > { %v1960_v4 = vpack.c.b16 %v1958_v15, %v1958_v15  ;;  %v1959_v7 = vpack.c.b16 %v1956_v20, %v1956_v20  ;;  %v2027_v5 = vrot.slane %v2024_v10, 7  ;;  %v2025_v60 = vrot.slane %v2022_v46, 7  ;;  %v2812_v29 = vld [vmem:[%s3890_s3 + $0x20] sm:$0xff]   ;;  %v2815_v20 = vld [vmem:[%s3890_s3 + $0x70] sm:$0xff]  }
 0x3b1   : > { %v1952_v16 = vsel %vm1157_vm4, %v1951_v37, %v1947_v47  ;;  %v1950_v32 = vsel %vm1157_vm4, %v1949_v38, %v1945_v50  ;;  %v2038_v31 = vsel %vm1157_vm4, %v2024_v10, %v2037_v62  ;;  %v2036_v36 = vsel %vm1157_vm4, %v2022_v46, %v2035_v2 }
 0x3b2   : > { %1963 = vrot.lane.b32.xlu1 %v1960_v4, %s2945_s14  ;;  %1961 = vrot.lane.b32.xlu0 %v1959_v7, %s2945_s14  ;;  %v2028_v48 = vsel %vm1157_vm4, %v2027_v5, %v2023_v61  ;;  %v2026_v56 = vsel %vm1157_vm4, %v2025_v60, %v2021_v25  ;;  %v2040_v63 = vpack.c.b16 %v2038_v31, %v2038_v31  ;;  %v2813_v61 = vld [vmem:[%s3890_s3 + $0x68] sm:$0xff]   ;;  %v2816_v4 = vld [vmem:[%s3890_s3 + $0x30] sm:$0xff]   ;;  %s3778_s14 = scalar_lea.sflag [#allocation5], %s2339_s17 }
 0x3b3   : > { %v2030_v59 = vpack.c.b16 %v2028_v48, %v2028_v48  ;;  %v2029_v39 = vpack.c.b16 %v2026_v56, %v2026_v56  ;;  %v2039_v17 = vpack.c.b16 %v2036_v36, %v2036_v36  ;;  %v1954_v34 = vpack.c.b16 %v1952_v16, %v1952_v16  ;;  %v2817_v7 = vld [vmem:[%s3890_s3 + $0x78] sm:$0xff]  }
 0x3b4   : > { %v1953_v40 = vpack.c.b16 %v1950_v32, %v1950_v32  ;;  %v2818_v5 = vld [vmem:[%s3890_s3 + $0x38] sm:$0xff]  }
 0x3b6   : > { %2033 = vrot.lane.b32.xlu1 %v2030_v59, %s2944_s22  ;;  %2031 = vrot.lane.b32.xlu0 %v2029_v39, %s2944_s22 }
 0x3ba   : > { %2043 = vrot.lane.b32.xlu1 %v2040_v63, %s2946_s15  ;;  %2041 = vrot.lane.b32.xlu0 %v2039_v17, %s2946_s15  ;;  %s2606_s15 = sshll.u32 %s3021_s28, 9 }
 0x3be   : > { %2082 = vrot.lane.b32.xlu0 %v3553_v18, %s3896_s8  ;;  %v2809_v18 = vld [vmem:[%s3890_s3 + $0x58] sm:$0xff]  }
 0x3bf   : > { %2659 = vmatprep.subr.bf16.mxu0 %v2809_v18 }
 0x3c0   : > { %2660 = vmatpush3.bf16.msra.mxu0 %v2810_v27 }
 0x3c1   : > { %2661 = vmatprep.subr.bf16.mxu0 %v2811_v52 }
 0x3c4   : > { %2662 = vmatpush3.bf16.msra.mxu0 %v2812_v29 }
 0x3c5   : > { %2663 = vmatprep.subr.bf16.mxu0 %v2813_v61 }
 0x3c8   : > { %2664 = vmatpush3.bf16.msra.mxu0 %v2814_v24 }
 0x3c9   : > { %2665 = vmatprep.subr.bf16.mxu0 %v2815_v20 }
 0x3cc   : > { %2666 = vmatpush3.bf16.msra.mxu0 %v2816_v4 }
 0x3cd   : > { %2667 = vmatprep.subr.bf16.mxu0 %v2817_v7 }
 0x3d0   : > { %2668 = vmatpush3.bf16.msra.mxu0 %v2818_v5 }
 0x424   : > { %v1964_v11 = vpop.permute.xlu1 %1963  ;;  %v1962_v19 = vpop.permute.xlu0 %1961 }
 0x425   : > { %v2050_v55 = vsel %vm479_vm0, %v1954_v34, %v1964_v11  ;;  %v2047_v42 = vsel %vm479_vm0, %v1953_v40, %v1962_v19 }
 0x428   : > { %v2034_v28 = vpop.permute.xlu1 %2033  ;;  %v2032_v35 = vpop.permute.xlu0 %2031 }
 0x429   : > { %v2054_v30 = vsel %vm504_vm1, %v2050_v55, %v2034_v28  ;;  %v2052_v43 = vsel %vm504_vm1, %v2047_v42, %v2032_v35 }
 0x42c   : > { %v2044_v9 = vpop.permute.xlu1 %2043  ;;  %v2042_v14 = vpop.permute.xlu0 %2041 }
 0x42d   : > { %v2058_v53 = vsel %vm521_vm2, %v2054_v30, %v2044_v9  ;;  %v2056_v51 = vsel %vm521_vm2, %v2052_v43, %v2042_v14 }
 0x42e   : > { %v2065_v58 = vshrl.u32 %v2058_v53, 16  ;;  %v2059_v44 = vshrl.u32 %v2056_v51, 16  ;;  %v2068_v45 = vshll.u32 %v2058_v53, 16  ;;  %v2062_v50 = vshll.u32 %v2056_v51, 16 }
 0x430   : > { %v2067_v54 = vrot.slane %v2065_v58, 7  ;;  %v2061_v47 = vrot.slane %v2059_v44, 7  ;;  %v2083_v60 = vpop.permute.xlu0 %2082 }
 0x431   : > { %v2096_v16 = vsel %vm594_vm3, %v3543_v33, %v2083_v60 }
 0x432   : > { %v2070_v22 = vor.u32 %v2068_v45, %v2067_v54  ;;  %v2064_v49 = vor.u32 %v2062_v50, %v2061_v47 }
 0x434   : > { %v2074_v57 = vsel %vm3527_vm9, 0, %v2070_v22  ;;  %v2073_v41 = vsel %vm3527_vm9, 0, %v2064_v49 }
 0x435   : > { %v2089_v12 = vshll.u32 %v2074_v57, 16  ;;  %v2078_v13 = vshll.u32 %v2073_v41, 16  ;;  %v2087_v25 = vshrl.u32 %v2074_v57, 16  ;;  %v2076_v38 = vshrl.u32 %v2073_v41, 16 }
 0x437   : > { %v2091_v37 = vrot.slane %v2089_v12, 1  ;;  %v2080_v10 = vrot.slane %v2078_v13, 1 }
 0x439   : > { %v2092_v46 = vor.u32 %v2091_v37, %v2087_v25  ;;  %v2081_v15 = vor.u32 %v2080_v10, %v2076_v38 }
 0x43b   : > { %2093 = vrot.lane.b32.xlu0 %v2092_v46, %s3896_s8  ;;  %2084 = vrot.lane.b32.xlu1 %v2081_v15, %s3896_s8  ;;  %s2826_s8 = scalar_lea.vmem %s2825_s21, 256 }
 0x43c   : > { %p2828_p1 = scmp.lt.s32.totalorder %s2826_s8, %s2820_s23 }
 0x43e   : > { %p2829_p2 = por %p2828_p1, %p2827_p0 }
 0x440   : > { %p2830_p3 = pnand %p2829_p2, %p2823_p13 }
 0x4ad   : > { %v2085_v62 = vpop.permute.xlu1 %2084  ;;  %v2094_v2 = vpop.permute.xlu0 %2093 }
 0x4ae   : > { %v2098_v32 = vsel %vm594_vm3, %v2073_v41, %v2085_v62  ;;  %v2100_v48 = vsel %vm594_vm3, %v2074_v57, %v2094_v2 }
 0x4af   : > { %v2104_v56 = vcombine.low %v2096_v16, %v2098_v32  ;;  %v2119_v59 = vcombine.low %v2098_v32, %v2100_v48 }
 0x4b1   : > { %v2111_v39 = vrot.slane %v2104_v56, %v3205_v21  ;;  %v2126_v31 = vrot.slane %v2119_v59, %v3205_v21 }
 0x4b3   : > { %v2118_v36 = vrot.slane %v2111_v39, %v3205_v21  ;;  %v2133_v63 = vrot.slane %v2126_v31, %v3205_v21 }
 0x4b5   : > { %v2170_v33 = vcombine.low %v2118_v36, %v2133_v63 }
 0x4b7   : > { %v2177_v17 = vrot.slane %v2170_v33, %v3205_v21 }
 0x4b9   : > { %v2178_v0 = vcombine.high %v2177_v17, %v2177_v17  ;;  %v2185_v8 = vrot.slane %v2177_v17, %v3205_v21 }
 0x4bb   : > { %v2192_v6 = vrot.slane %v2178_v0, %v3205_v21 }
 0x4bd   : > { %2323 = vmatprep.mubr.bf16.mxu0 %v2192_v6 }
 0x4be   : > { %2324 = vmatmul.mubr.bf16.vlgmr.msra.gmra.mrb[8].mxu0 %v2185_v8 }
 0x4bf   : > { %2833 = shalt.err (!%p2830_p3)
}
 0x4c0   : > { %s2834_s17 = scalar_lea.hbm %s3775_s16, 128  ;;  %s2838_s22 = scalar_lea.hbm %s3893_s6, 256 }
 0x4c1   : > { %p2835_p4 = scmp.ne.s32.totalorder %s3775_s16, %s2834_s17  ;;  %p2839_p9 = scmp.lt.u32.totalorder %s3775_s16, %s3893_s6 }
 0x4c2   : > { %p2840_p10 = scmp.lt.u32.totalorder %s2838_s22, %s2834_s17  ;;  %p2842_p12 = scmp.lt.u32.totalorder %s2834_s17, %s3775_s16 }
 0x4c3   : > { %p2836_p7 = pnand %p2835_p4, %p3040_p5 }
 0x4c4   : > { %p2841_p11 = por %p2840_p10, %p2839_p9 }
 0x4c5   : > { %p2837_p8 = pneg %p2836_p7 }
 0x4c6   : > { %p2843_p13 = por %p2842_p12, %p2841_p11 }
 0x4c8   : > { %p2844_p0 = pnand %p2843_p13, %p2837_p8 }
 0x4ca   : > { %2847 = shalt.err (!%p2844_p0)
}
 0x4cb   : > { %s2957_s8 = smov 4   ;;  %s3906_s23 = smov 64  }
 0x4cc   : > { %2713 = dma.vmem_to_hbm [thread:$0]  (%p3040_p5), %s3768_s13, 128, %s3775_s16, %s3778_s14, %s3906_s23, %s3906_s23, %s2957_s8  }
 0x4cd   : > { %s3810_s29 = scalar_lea.hbm %s3892_s5, %s2606_s15  ;;  %s2335_s22 = scalar_lea.sflag [#allocation3], %s3197_s18 }
 0x4ce   : > { %s2848_s20 = scalar_lea.vmem %s3766_s9, 512  ;;  %s2958_s21 = smov [#allocation2]  }
 0x4cf   : > { %p2849_p1 = scmp.ne.s32.totalorder %s3766_s9, %s2848_s20  ;;  %s2852_s0 = sshll.u32 %s2958_s21, 4  ;;  %s2853_s0 = int_to_ptr.vmem [resolvable:$false] %s2852_s0 }
 0x4d0   : > { %s2854_s1 = scalar_lea.vmem %s2853_s0, 1024  ;;  %p2855_p4 = scmp.lt.s32.totalorder %s3766_s9, %s2853_s0 }
 0x4d1   : > { %p2850_p2 = pnand %p2849_p1, %p3040_p5  ;;  %p2856_p7 = scmp.lt.s32.totalorder %s2854_s1, %s2848_s20 }
 0x4d3   : > { %p2851_p3 = pneg %p2850_p2  ;;  %p2857_p8 = por %p2856_p7, %p2855_p4 }
 0x4d5   : > { %p2858_p9 = pnand %p2857_p8, %p2851_p3 }
 0x4d7   : > { %2861 = shalt.err (!%p2858_p9)
}
 0x4d8   : > { %s2862_s13 = scalar_lea.hbm %s3810_s29, 512  ;;  %s2866_s17 = scalar_lea.hbm %s3892_s5, 1024 }
 0x4d9   : > { %p2863_p10 = scmp.ne.s32.totalorder %s3810_s29, %s2862_s13  ;;  %p2867_p13 = scmp.lt.u32.totalorder %s3810_s29, %s3892_s5 }
 0x4da   : > { %p2868_p0 = scmp.lt.u32.totalorder %s2866_s17, %s2862_s13  ;;  %p2870_p2 = scmp.lt.u32.totalorder %s2862_s13, %s3810_s29 }
 0x4db   : > { %p2864_p11 = pnand %p2863_p10, %p3040_p5 }
 0x4dc   : > { %p2869_p1 = por %p2868_p0, %p2867_p13 }
 0x4dd   : > { %p2865_p12 = pneg %p2864_p11 }
 0x4de   : > { %p2871_p3 = por %p2870_p2, %p2869_p1 }
 0x4e0   : > { %p2872_p4 = pnand %p2871_p3, %p2865_p12 }
 0x4e2   : > { %2875 = shalt.err (!%p2872_p4)
}
 0x4e3   : > { %2712 = dma.vmem_to_hbm [thread:$0]  (%p3040_p5), %s3766_s9, 512, %s3810_s29, %s2335_s22, %s3906_s23, %s3906_s23, %s2957_s8   ;;  %v2168_v21 = vsub.s32 2, %v3185_v1 }
 0x4e4   : > { %s2516_s1 = sshll.u32 %s3197_s18, 1  ;;  %v2819_v26 = vld [vmem:[%s3891_s4] sm:$0x7]  ;;  %s2593_s13 = sshll.u32 %s3021_s28, 5 }
 0x4e5   : > { %v2169_v23 = vrot.slane %v2819_v26, %v2168_v21  ;;  %s289_s16 = scalar_lea.vmem [#allocation6], %s2516_s1  ;;  %s3848_s18 = scalar_lea.hbm %s3894_s7, %s2593_s13 }
 0x4e6   : > { %s2390_s15 = sshll.u32 %s289_s16, 4  ;;  %s2959_s29 = smov [#allocation6]   ;;  %s2391_s15 = int_to_ptr.vmem [resolvable:$true] %s2390_s15 }
 0x4e7   : > { %s2876_s23 = scalar_lea.vmem %s2391_s15, 32  ;;  %s2880_s22 = sshll.u32 %s2959_s29, 4  ;;  %s2881_s22 = int_to_ptr.vmem [resolvable:$false] %s2880_s22 }
 0x4e8   : > { %p2877_p7 = scmp.ne.s32.totalorder %s2391_s15, %s2876_s23  ;;  %s2882_s28 = scalar_lea.vmem %s2881_s22, 64 }
 0x4e9   : > { %p2883_p10 = scmp.lt.s32.totalorder %s2391_s15, %s2881_s22  ;;  %p2884_p11 = scmp.lt.s32.totalorder %s2882_s28, %s2876_s23 }
 0x4ea   : > { %p2878_p8 = pnand %p2877_p7, %p3040_p5 }
 0x4eb   : > { %p2885_p12 = por %p2884_p11, %p2883_p10 }
 0x4ec   : > { %p2879_p9 = pneg %p2878_p8 }
 0x4ee   : > { %p2886_p13 = pnand %p2885_p12, %p2879_p9 }
 0x591   : > { %v2669_v3 = vpop.f32.mrb[8].mxu0 }
 0x592   : > { %v2670_v18 = vpop.f32.mrb[9].mxu0 }
 0x593   : > { %v2671_v27 = vadd.f32 %v2670_v18, %v2669_v3  ;;  %v2672_v11 = vpop.f32.mrb[10].mxu0 }
 0x594   : > { %v2673_v19 = vpop.f32.mrb[11].mxu0 }
 0x595   : > { %v2326_v28 = vadd.f32 %v2671_v27, %v2169_v23 }
 0x597   : > { %v2331_v35 = vmax.f32 %v2326_v28, 0.0 }
 0x599   : > { %v2332_v34 = vpack.c.bf16 %v2331_v35, %v2331_v35 }
 0x59b   : > { %2333 = vst [vmem:[%s289_s16] sm:$0x3] %v2332_v34 }
 0x59c   : > { %2889 = shalt.err (!%p2886_p13)
}
 0x59d   : > { %s2890_s17 = scalar_lea.hbm %s3848_s18, 32  ;;  %s2894_s1 = scalar_lea.hbm %s3894_s7, 64 }
 0x59e   : > { %p2891_p0 = scmp.ne.s32.totalorder %s3848_s18, %s2890_s17  ;;  %p2895_p3 = scmp.lt.u32.totalorder %s3848_s18, %s3894_s7 }
 0x59f   : > { %p2896_p4 = scmp.lt.u32.totalorder %s2894_s1, %s2890_s17  ;;  %p2898_p8 = scmp.lt.u32.totalorder %s2890_s17, %s3848_s18 }
 0x5a0   : > { %p2892_p1 = pnand %p2891_p0, %p3040_p5 }
 0x5a1   : > { %p2897_p7 = por %p2896_p4, %p2895_p3 }
 0x5a2   : > { %p2893_p2 = pneg %p2892_p1 }
 0x5a3   : > { %p2899_p9 = por %p2898_p8, %p2897_p7 }
 0x5a5   : > { %p2900_p10 = pnand %p2899_p9, %p2893_p2 }
 0x5a7   : > { %2903 = shalt.err (!%p2900_p10)
}
 0x5a8   : > { %2714 = dma.vmem_to_hbm [thread:$0]  (%p3040_p5), %s2391_s15, 32, %s3848_s18, %s3778_s14  }
 0x5a9 PF: > { %p2728_p11 = scmp.ge.s32.totalorder %s2942_s27, 2  ;;  %s2402_s13 = sand.u32 1, %s2930_s24  }
 0x5aa   : > { %s2403_s16 = scalar_lea.sflag [#allocation3], %s2402_s13 }
 0x5ab   : > { %p2719_p12 = pnand %p2728_p11, %p3044_p6 }
 0x5ad   : > { %2921 = dma.done.wait (!%p2719_p12), %s2403_s16, 512  }
 0x5ae   : > { %2923 = vsyncadd (!%p2719_p12), %s2403_s16, 4294966784  ;;  %s3907_s9 = sadd.s32 4294967294, %s2942_s27  }
 0x5af   : > { %s2411_s8 = sand.u32 1, %s3907_s9  }
 0x5b0   : > { %s2412_s23 = scalar_lea.sflag [#allocation5], %s2411_s8 }
 0x5b1   : > { %2925 = dma.done.wait (!%p2719_p12), %s2412_s23, 160  }
 0x5b2   : > { %2927 = vsyncadd (!%p2719_p12), %s2412_s23, 4294967136  ;;  %p21_p5 = scmp.ge.s32.totalorder %s3025_s30, 4   ;;  %s3908_s24 = smov %s2934_s25 }
 0x5b3   : > { %s3909_s25 = smov %s2938_s26  ;;  %s3910_s26 = smov %s3038_s10 }
 0x5b4   : > { %s3911_s27 = smov %s3025_s30  ;;  %23 = sbr.rel (!%p21_p5) target bundleno = 8 (0x8), region = 107 }
 0x5bb   :  { %2426 = vsyncpa [#allocation3], 1 }
 0x5bc   :  { %2428 = vsyncpa [#allocation3 + $0x1], 1 }
 0x5bd   :  { %2429 = vsyncpa [#allocation5], 1 }
 0x5be   :  { %2431 = vsyncpa [#allocation5 + $0x1], 1 }

</bundles_post_ra>
